<compile_context>
chip_gen: v6e
topology: v6e:2x2x1
jax: 0.10.0
libtpu: 0.0.40
codegen_flags: <defaults>
</compile_context>

<pallas_src>
import functools

import numpy as np
import jax
import jax.numpy as jnp
from jax.experimental import pallas as pl
from jax.experimental.pallas import tpu as pltpu


def _round_up(x, m):
    return ((x + m - 1) // m) * m


# ----------------------------------------------------------------------------
# Core Pallas kernel: Y = X @ W + b   (X resident, W streamed, K-reduction)
# ----------------------------------------------------------------------------
def _matmul_bias_kernel(x_ref, w_ref, b_ref, o_ref, acc_ref, *, tk, tn):
    n = pl.program_id(0)
    k = pl.program_id(1)

    @pl.when(k == 0)
    def _():
        acc_ref[...] = jnp.zeros_like(acc_ref)

    x_blk = x_ref[:, pl.ds(pl.multiple_of(k * tk, tk), tk)]
    acc_ref[...] += jnp.dot(x_blk, w_ref[...],
                            preferred_element_type=jnp.float32)

    @pl.when(k == pl.num_programs(1) - 1)
    def _():
        b_blk = b_ref[:, pl.ds(pl.multiple_of(n * tn, tn), tn)]
        o_ref[...] = (acc_ref[...] + b_blk).astype(o_ref.dtype)


def matmul_bias(x2d, w, b):
    """(M, K) @ (K, N) + b[N] -> (M, N) f32, via one Pallas TPU call."""
    M, K = x2d.shape
    Kw, N = w.shape
    assert K == Kw

    Mp = _round_up(M, 8)
    Np = _round_up(N, 128)
    Kp0 = _round_up(K, 128)

    # Big K tiles: single K block for anything small, 1024-wide tiles for the
    # huge psp_bneck reduction (36864 -> 36 steps instead of 288).
    if Kp0 <= 2304:
        tk = Kp0
    elif Kp0 % 1024 == 0:
        tk = 1024
    elif Kp0 % 512 == 0:
        tk = 512
    else:
        tk = 1024
    Kp = _round_up(K, tk)

    # 256-wide output tiles match the 256-wide MXU and keep >=2 "parallel"
    # n-blocks for N>=512 (v7x megacore); fall back to 128 otherwise.
    tn = 256 if (Np >= 256 and Np % 256 == 0) else 128

    xb = x2d.astype(jnp.bfloat16)
    wb = w.astype(jnp.bfloat16)
    bf = b.astype(jnp.float32).reshape(1, N)

    # Only pay pad copies when actually misaligned.
    if (Mp, Kp) != (M, K):
        xb = jnp.pad(xb, ((0, Mp - M), (0, Kp - K)))
    if (Kp, Np) != (K, N):
        wb = jnp.pad(wb, ((0, Kp - K), (0, Np - N)))
    if Np != N:
        bf = jnp.pad(bf, ((0, 0), (0, Np - N)))

    grid = (Np // tn, Kp // tk)
    kernel = functools.partial(_matmul_bias_kernel, tk=tk, tn=tn)

    out = pl.pallas_call(
        kernel,
        out_shape=jax.ShapeDtypeStruct((Mp, Np), jnp.float32),
        grid_spec=pltpu.PrefetchScalarGridSpec(
            num_scalar_prefetch=0,
            grid=grid,
            in_specs=[
                # X full-K resident in VMEM: constant block index -> one DMA
                # total, no per-n-block refetch (max ~5.3 MB bf16 in this model).
                pl.BlockSpec((Mp, Kp), lambda n, k: (0, 0)),
                # W streamed in (tk, tn) bf16 tiles.
                pl.BlockSpec((tk, tn), lambda n, k: (k, n)),
                # Bias resident (tiny), sliced in the epilogue only.
                pl.BlockSpec((1, Np), lambda n, k: (0, 0)),
            ],
            out_specs=pl.BlockSpec((Mp, tn), lambda n, k: (0, n)),
            scratch_shapes=[pltpu.VMEM((Mp, tn), jnp.float32)],
        ),
        compiler_params=pltpu.CompilerParams(
            dimension_semantics=("parallel", "arbitrary"),
            # Worst case (psp_bneck) ~12 MB with double buffering; 32 MiB keeps
            # v5e (16 MiB default) happy and stays within v7x's 64 MiB VMEM.
            vmem_limit_bytes=32 * 1024 * 1024,
        ),
    )(xb, wb, bf)

    if (Mp, Np) != (M, N):
        out = out[:M, :N]
    return out


# ----------------------------------------------------------------------------
# Conv helpers (1x1 and 3x3 via im2col), BN fusion, affine composition
# ----------------------------------------------------------------------------
def fuse_bn(w, bn, eps=1e-5):
    """Fold eval-mode BatchNorm into conv weight (..., Cout) and bias."""
    scale = bn["gamma"] / jnp.sqrt(bn["var"] + eps)
    return w * scale, bn["beta"] - bn["mean"] * scale


def compose_1x1(w1, b1, w2, b2):
    """(x @ w1 + b1) @ w2 + b2 == x @ (w1 @ w2) + (b1 @ w2 + b2).

    Exact because the provided spec has no activation between these convs
    (Conv+BN only; Dropout2d is identity in eval mode).
    """
    return jnp.dot(w1, w2), jnp.dot(b1, w2) + b2


def conv1x1(x, w, b):
    """x: (N,H,W,Cin), w: (Cin,Cout), b: (Cout,)"""
    N, H, W, C = x.shape
    y = matmul_bias(x.reshape(N * H * W, C), w, b)
    return y.reshape(N, H, W, -1)


def conv1x1_bn(x, w, bn):
    wf, bf = fuse_bn(w, bn)
    return conv1x1(x, wf, bf)


def _im2col_3x3(x):
    """x: (N,H,W,C) -> (N*H*W, 9*C), taps ordered (ky,kx,c) to match HWIO."""
    N, H, W, C = x.shape
    xp = jnp.pad(x, ((0, 0), (1, 1), (1, 1), (0, 0)))
    cols = jnp.concatenate(
        [xp[:, dy:dy + H, dx:dx + W, :] for dy in range(3) for dx in range(3)],
        axis=-1)
    return cols.reshape(N * H * W, 9 * C)


def conv3x3(x, w_hwio, b):
    """x: (N,H,W,Cin), w_hwio: (3,3,Cin,Cout), padding=1, stride=1."""
    # TODO(synk): fold the 9 taps into the K-reduction grid (shifted-window
    # index_map) to avoid materializing the im2col tensor in HBM entirely;
    # building it in bf16 already halves that traffic.
    N, H, W, C = x.shape
    rows = _im2col_3x3(x.astype(jnp.bfloat16))
    y = matmul_bias(rows, w_hwio.reshape(9 * C, -1), b)
    return y.reshape(N, H, W, -1)


def conv3x3_bn(x, w_hwio, bn):
    wf, bf = fuse_bn(w_hwio, bn)
    return conv3x3(x, wf, bf)


def conv3x3_shared(xs, w_hwio, b):
    """Apply the SAME 3x3 conv to several NHWC tensors with ONE matmul
    (im2col rows stacked along M: one weight DMA, one pallas_call)."""
    C = xs[0].shape[-1]
    rows = [_im2col_3x3(x.astype(jnp.bfloat16)) for x in xs]
    sizes = [r.shape[0] for r in rows]
    y = matmul_bias(jnp.concatenate(rows, axis=0), w_hwio.reshape(9 * C, -1), b)
    outs, off = [], 0
    for x, m in zip(xs, sizes):
        N, H, W, _ = x.shape
        outs.append(y[off:off + m].reshape(N, H, W, -1))
        off += m
    return outs


def _interp_matrix(inp, out):
    """align_corners=True bilinear interpolation matrix (out, inp)."""
    M = np.zeros((out, inp), dtype=np.float32)
    if inp == 1:
        M[:, 0] = 1.0
        return jnp.asarray(M)
    for i in range(out):
        src = 0.0 if out == 1 else i * (inp - 1) / (out - 1)
        lo = int(np.floor(src))
        hi = min(lo + 1, inp - 1)
        f = src - lo
        M[i, lo] += 1.0 - f
        M[i, hi] += f
    return jnp.asarray(M)


def resize_bilinear_ac(x, oh, ow):
    """F.interpolate(..., mode='bilinear', align_corners=True) on NHWC."""
    Mh = _interp_matrix(x.shape[1], oh)
    Mw = _interp_matrix(x.shape[2], ow)
    x = jnp.einsum("oh,nhwc->nowc", Mh, x)
    x = jnp.einsum("pw,nowc->nopc", Mw, x)
    return x


def adaptive_avg_pool(x, s):
    """nn.AdaptiveAvgPool2d((s, s)) on NHWC (PyTorch bin boundaries)."""
    N, H, W, C = x.shape
    rows = []
    for i in range(s):
        h0, h1 = (i * H) // s, -((-(i + 1) * H) // s)
        cols = []
        for j in range(s):
            w0, w1 = (j * W) // s, -((-(j + 1) * W) // s)
            cols.append(jnp.mean(x[:, h0:h1, w0:w1, :], axis=(1, 2)))
        rows.append(jnp.stack(cols, axis=1))
    return jnp.stack(rows, axis=1)  # (N, s, s, C)


# ----------------------------------------------------------------------------
# Deterministic parameter initialization (synthetic; eval-mode BN stats)
# ----------------------------------------------------------------------------
def _conv_w(key, cin, cout, k=1, scale=0.05):
    shape = (cin, cout) if k == 1 else (k, k, cin, cout)
    return scale * jax.random.normal(key, shape, jnp.float32)


def _bn(key, c):
    k1, k2, k3, k4 = jax.random.split(key, 4)
    return dict(
        gamma=1.0 + 0.2 * jax.random.normal(k1, (c,), jnp.float32),
        beta=0.1 * jax.random.normal(k2, (c,), jnp.float32),
        mean=0.1 * jax.random.normal(k3, (c,), jnp.float32),
        var=0.5 + jax.random.uniform(k4, (c,), jnp.float32),
    )


def init_params(key, num_part):
    keys = iter(jax.random.split(key, 64))
    nk = lambda: next(keys)
    p = {}
    # PSPModule(2048, 512, sizes=(1,2,3,6))
    p["psp_stages"] = [dict(w=_conv_w(nk(), 2048, 512), bn=_bn(nk(), 512))
                       for _ in range(4)]
    p["psp_bneck"] = dict(w=_conv_w(nk(), 2048 + 4 * 512, 512, k=3),
                          bn=_bn(nk(), 512))
    # Decoder_Module(num_part)
    p["dec"] = dict(
        c1_w=_conv_w(nk(), 512, 256), c1_bn=_bn(nk(), 256),
        c2_w=_conv_w(nk(), 256, 48), c2_bn=_bn(nk(), 48),
        c3a_w=_conv_w(nk(), 304, 256), c3a_bn=_bn(nk(), 256),
        c3b_w=_conv_w(nk(), 256, 256), c3b_bn=_bn(nk(), 256),
        c4_w=_conv_w(nk(), 256, num_part),
        c4_b=0.05 * jax.random.normal(nk(), (num_part,), jnp.float32),
    )
    # Edge_Module([256,512,1024], 256, 2)
    p["edge"] = dict(
        c1_w=_conv_w(nk(), 256, 256), c1_bn=_bn(nk(), 256),
        c2_w=_conv_w(nk(), 512, 256), c2_bn=_bn(nk(), 256),
        c3_w=_conv_w(nk(), 1024, 256), c3_bn=_bn(nk(), 256),
        c4_w=_conv_w(nk(), 256, 2, k=3),
        c4_b=0.05 * jax.random.normal(nk(), (2,), jnp.float32),
        c5_w=_conv_w(nk(), 6, 2),
        c5_b=0.05 * jax.random.normal(nk(), (2,), jnp.float32),
    )
    # fushion
    p["fus"] = dict(
        c1_w=_conv_w(nk(), 1024, 256), c1_bn=_bn(nk(), 256),
        c2_w=_conv_w(nk(), 256, num_part),
        c2_b=0.05 * jax.random.normal(nk(), (num_part,), jnp.float32),
    )
    return p


# ----------------------------------------------------------------------------
# Module forwards (NHWC)
# ----------------------------------------------------------------------------
def psp_forward(p, feats):
    N, H, W, C = feats.shape
    sizes = (1, 2, 3, 6)
    # Stack the 4 stage 1x1 convs along N and the pooled pyramids along M so
    # all stages run through a single pallas_call (one launch instead of four).
    ws, bs = zip(*[fuse_bn(st["w"], st["bn"]) for st in p["psp_stages"]])
    cout = ws[0].shape[1]
    w_all = jnp.concatenate(ws, axis=1)         # (2048, 4*cout)
    b_all = jnp.concatenate(bs, axis=0)         # (4*cout,)
    pooled = [adaptive_avg_pool(feats, s) for s in sizes]
    x_all = jnp.concatenate([q.reshape(-1, C) for q in pooled], axis=0)
    y_all = matmul_bias(x_all, w_all, b_all)    # (sum N*s*s, 4*cout)

    priors, off = [], 0
    for i, s in enumerate(sizes):
        m = N * s * s
        y = y_all[off:off + m, cout * i:cout * (i + 1)].reshape(N, s, s, cout)
        priors.append(resize_bilinear_ac(y, H, W))
        off += m
    priors.append(feats)
    cat = jnp.concatenate(priors, axis=-1)      # (N,H,W,4096)
    return conv3x3_bn(cat, p["psp_bneck"]["w"], p["psp_bneck"]["bn"])


def decoder_forward(d, xt, xl):
    h, w = xl.shape[1], xl.shape[2]
    xt = conv1x1_bn(xt, d["c1_w"], d["c1_bn"])
    xt = resize_bilinear_ac(xt, h, w)
    xl = conv1x1_bn(xl, d["c2_w"], d["c2_bn"])
    x = jnp.concatenate([xt, xl], axis=-1)                  # 304 channels
    # conv3 = two back-to-back affine 1x1 convs (no activation in the spec):
    # compose into a single 304 -> 256 matmul.
    w1, b1 = fuse_bn(d["c3a_w"], d["c3a_bn"])
    w2, b2 = fuse_bn(d["c3b_w"], d["c3b_bn"])
    wc, bc = compose_1x1(w1, b1, w2, b2)
    x = conv1x1(x, wc, bc)
    seg = conv1x1(x, d["c4_w"], d["c4_b"])
    return seg, x


def edge_forward(e, x1, x2, x3):
    h, w = x1.shape[1], x1.shape[2]
    e1f = conv1x1_bn(x1, e["c1_w"], e["c1_bn"])
    e2f = conv1x1_bn(x2, e["c2_w"], e["c2_bn"])
    e3f = conv1x1_bn(x3, e["c3_w"], e["c3_bn"])
    # conv4 shares one weight across the three scales -> single stacked matmul.
    e1, e2, e3 = conv3x3_shared([e1f, e2f, e3f], e["c4_w"], e["c4_b"])
    e2f = resize_bilinear_ac(e2f, h, w)
    e3f = resize_bilinear_ac(e3f, h, w)
    e2 = resize_bilinear_ac(e2, h, w)
    e3 = resize_bilinear_ac(e3, h, w)
    edge = jnp.concatenate([e1, e2, e3], axis=-1)           # 6 channels
    edge_fea = jnp.concatenate([e1f, e2f, e3f], axis=-1)    # 768 channels
    edge = conv1x1(edge, e["c5_w"], e["c5_b"])
    return edge, edge_fea


def part_model_forward(p, x, x1, x2, x3):
    to_nhwc = lambda a: jnp.transpose(a, (0, 2, 3, 1))
    to_nchw = lambda a: jnp.transpose(a, (0, 3, 1, 2))
    x, x1, x2, x3 = map(to_nhwc, (x, x1, x2, x3))

    ctx = psp_forward(p, x)                                   # (N,h,w,512)
    parsing_result, parsing_fea = decoder_forward(p["dec"], ctx, x1)
    edge_result, edge_fea = edge_forward(p["edge"], x1, x2, x3)

    xcat = jnp.concatenate([parsing_fea, edge_fea], axis=-1)  # 1024 channels
    f = p["fus"]
    # fusion = conv1x1+BN -> Dropout2d(0.1) [eval: identity] -> conv1x1+bias:
    # both maps are affine -> compose into one 1024 -> num_part matmul.
    # TODO(synk): training-mode channel dropout would need an RNG mask.
    w1, b1 = fuse_bn(f["c1_w"], f["c1_bn"])
    wc, bc = compose_1x1(w1, b1, f["c2_w"], f["c2_b"])
    fusion_result = conv1x1(xcat, wc, bc)

    return ([[to_nchw(parsing_result), to_nchw(fusion_result)],
             [to_nchw(edge_result)]],
            to_nchw(xcat))


# ----------------------------------------------------------------------------
if __name__ == "__main__":
    num_part = 7
    key = jax.random.PRNGKey(0)
    kp, kx, k1, k2, k3 = jax.random.split(key, 5)

    params = init_params(kp, num_part)

    B = 2
    # NCHW inputs, mirroring the PyTorch forward signature.
    x = jax.random.normal(kx, (B, 2048, 6, 6), jnp.float32)
    x1 = jax.random.normal(k1, (B, 256, 12, 12), jnp.float32)
    x2 = jax.random.normal(k2, (B, 512, 6, 6), jnp.float32)
    x3 = jax.random.normal(k3, (B, 1024, 6, 6), jnp.float32)

    branches, fused = part_model_forward(params, x, x1, x2, x3)
    jax.block_until_ready(branches)
    jax.block_until_ready(fused)

    assert branches[0][0].shape == (B, num_part, 12, 12)   # parsing_result
    assert branches[0][1].shape == (B, num_part, 12, 12)   # fusion_result
    assert branches[1][0].shape == (B, 2, 12, 12)          # edge_result
    assert fused.shape == (B, 1024, 12, 12)                # cat(parsing_fea, edge_fea)
    assert all(bool(jnp.all(jnp.isfinite(a))) for a in
               (branches[0][0], branches[0][1], branches[1][0], fused))

    print("KERNEL_OK")
</pallas_src>

<mosaic_0001>
module attributes {stable_mosaic.version = 11 : i64} {
  func.func @_matmul_bias_kernel(%arg0: i32, %arg1: i32, %arg2: memref<104x2048xbf16, #tpu.memory_space<vmem>>, %arg3: memref<2048x256xbf16, #tpu.memory_space<vmem>>, %arg4: memref<1x2048xf32, #tpu.memory_space<vmem>>, %arg5: memref<104x256xf32, #tpu.memory_space<vmem>>, %arg6: memref<104x256xf32, #tpu.memory_space<vmem>>) attributes {dimension_semantics = [#tpu.dimension_semantics<parallel>, #tpu.dimension_semantics<arbitrary>], iteration_bounds = array<i64: 8, 1>, scalar_prefetch = 0 : i64, scratch_operands = 1 : i64, tpu.core_type = #tpu.core_type<tc>, window_params = [{pipeline_mode = #tpu.pipeline_mode<synchronous>, transform_indices = @transform_0, window_bounds = array<i64: 104, 2048>}, {transform_indices = @transform_1, window_bounds = array<i64: 2048, 256>}, {pipeline_mode = #tpu.pipeline_mode<synchronous>, transform_indices = @transform_2, window_bounds = array<i64: 1, 2048>}, {transform_indices = @transform_3, window_bounds = array<i64: 104, 256>}]} {
    %c0_i32 = arith.constant 0 : i32
    %0 = arith.cmpi eq, %arg1, %c0_i32 : i32
    %1 = arith.extui %0 : i1 to i32
    %c0_i32_0 = arith.constant 0 : i32
    %2 = arith.cmpi ne, %1, %c0_i32_0 : i32
    scf.if %2 {
      %cst_9 = arith.constant 0.000000e+00 : f32
      %15 = vector.broadcast %cst_9 : f32 to vector<104x256xf32>
      %c0_10 = arith.constant 0 : index
      %c0_11 = arith.constant 0 : index
      %16 = vector.load %arg6[%c0_10, %c0_11] : memref<104x256xf32, #tpu.memory_space<vmem>>, vector<104x256xf32>
      tpu.vector_store %arg6[%c0_10, %c0_11], %15 {strides = array<i32>} : memref<104x256xf32, #tpu.memory_space<vmem>>, vector<104x256xf32>,
    } else {
    }
    %c2048_i32 = arith.constant 2048 : i32
    %3 = arith.muli %arg1, %c2048_i32 : i32
    %4 = tpu.assume_multiple %3, 2048 : i32
    %c0 = arith.constant 0 : index
    %5 = arith.index_cast %4 : i32 to index
    %6 = vector.load %arg2[%c0, %5] : memref<104x2048xbf16, #tpu.memory_space<vmem>>, vector<104x2048xbf16>
    %c0_1 = arith.constant 0 : index
    %c0_2 = arith.constant 0 : index
    %7 = vector.load %arg6[%c0_1, %c0_2] : memref<104x256xf32, #tpu.memory_space<vmem>>, vector<104x256xf32>
    %c0_3 = arith.constant 0 : index
    %c0_4 = arith.constant 0 : index
    %8 = vector.load %arg3[%c0_3, %c0_4] : memref<2048x256xbf16, #tpu.memory_space<vmem>>, vector<2048x256xbf16>
    %cst = arith.constant dense<0.000000e+00> : vector<104x256xf32>
    %9 = tpu.matmul %6, %8, %cst {dimension_numbers = #tpu.dot_dimension_numbers<[1], [0], [0], [1], [0, 0, 1, 1], [], []>} : vector<104x2048xbf16>, vector<2048x256xbf16>, vector<104x256xf32> -> vector<104x256xf32>
    %10 = arith.addf %7, %9 : vector<104x256xf32>
    %c0_5 = arith.constant 0 : index
    %c0_6 = arith.constant 0 : index
    %11 = vector.load %arg6[%c0_5, %c0_6] : memref<104x256xf32, #tpu.memory_space<vmem>>, vector<104x256xf32>
    tpu.vector_store %arg6[%c0_5, %c0_6], %10 {strides = array<i32>} : memref<104x256xf32, #tpu.memory_space<vmem>>, vector<104x256xf32>,
    %c0_i32_7 = arith.constant 0 : i32
    %12 = arith.cmpi eq, %arg1, %c0_i32_7 : i32
    %13 = arith.extui %12 : i1 to i32
    %c0_i32_8 = arith.constant 0 : i32
    %14 = arith.cmpi ne, %13, %c0_i32_8 : i32
    scf.if %14 {
      %c256_i32 = arith.constant 256 : i32
      %15 = arith.muli %arg0, %c256_i32 : i32
      %16 = tpu.assume_multiple %15, 256 : i32
      %c0_9 = arith.constant 0 : index
      %17 = arith.index_cast %16 : i32 to index
      %18 = vector.load %arg4[%c0_9, %17] : memref<1x2048xf32, #tpu.memory_space<vmem>>, vector<1x256xf32>
      %c0_10 = arith.constant 0 : index
      %c0_11 = arith.constant 0 : index
      %19 = vector.load %arg6[%c0_10, %c0_11] : memref<104x256xf32, #tpu.memory_space<vmem>>, vector<104x256xf32>
      %20 = vector.broadcast %18 : vector<1x256xf32> to vector<104x256xf32>
      %21 = arith.addf %19, %20 : vector<104x256xf32>
      %c0_12 = arith.constant 0 : index
      %c0_13 = arith.constant 0 : index
      %22 = vector.load %arg5[%c0_12, %c0_13] : memref<104x256xf32, #tpu.memory_space<vmem>>, vector<104x256xf32>
      tpu.vector_store %arg5[%c0_12, %c0_13], %21 {strides = array<i32>} : memref<104x256xf32, #tpu.memory_space<vmem>>, vector<104x256xf32>,
    } else {
    }
    return
  }
  func.func @transform_0(%arg0: i32, %arg1: i32) -> (i32, i32) {
    %c0_i32 = arith.constant 0 : i32
    %c0_i32_0 = arith.constant 0 : i32
    %c0_i32_1 = arith.constant 0 : i32
    return %c0_i32, %c0_i32_0 : i32, i32
  }
  func.func @transform_1(%arg0: i32, %arg1: i32) -> (i32, i32) {
    %c0_i32 = arith.constant 0 : i32
    return %arg1, %arg0 : i32, i32
  }
  func.func @transform_2(%arg0: i32, %arg1: i32) -> (i32, i32) {
    %c0_i32 = arith.constant 0 : i32
    %c0_i32_0 = arith.constant 0 : i32
    %c0_i32_1 = arith.constant 0 : i32
    return %c0_i32, %c0_i32_0 : i32, i32
  }
  func.func @transform_3(%arg0: i32, %arg1: i32) -> (i32, i32) {
    %c0_i32 = arith.constant 0 : i32
    %c0_i32_0 = arith.constant 0 : i32
    return %c0_i32, %arg0 : i32, i32
  }
}

</mosaic_0001>

<bundles_post_ra>
// kernel: tpu_custom_call.1
= control target key start
LH: loop header
LB: loop body
LE: loop exit
PB: predicated region body
PF: predicated region fallthrough
CT: control target
= control target key end

     0   :  { %s5451_s0 = inlined_call_operand.hbm [shape: bf16[104,2048], index: 0, kind: input, shape index: {}]   ;;  %s5452_s1 = inlined_call_operand.hbm [shape: bf16[2048,2048], index: 1, kind: input, shape index: {}]   ;;  %s5453_s2 = inlined_call_operand.hbm [shape: f32[1,2048], index: 2, kind: input, shape index: {}]   ;;  %s5454_s3 = inlined_call_operand.hbm [shape: f32[104,2048], index: 3, kind: output, shape index: {}]  }
   0x1   :  { %5461 = sst [smem:[#allocation41_spill]] %s5453_s2 }
   0x2   :  { %8 = vsyncpa [#allocation4], 0 }
   0x3   :  { %9 = vsyncpa [#allocation7], 0 }
   0x4   :  { %11 = vsyncpa [#allocation7 + $0x1], 0 }
   0x5   :  { %12 = vsyncpa [#allocation5], 0 }
   0x6   :  { %14 = vsyncpa [#allocation5 + $0x1], 0  ;;  %s4632_s12 = smov 0   ;;  %s4634_s13 = smov 0  }
   0x7   :  { %s4636_s14 = smov 0   ;;  %s4638_s15 = smov 0  }
   0x8   :  { %s4640_s16 = smov 0   ;;  %s4642_s17 = smov 0  }
   0x9 LB: > { %s4663_s18 = sadd.s32 4294967295, %s4599_s17   ;;  %s3553_s19 = sadd.s32 4294967294, %s4599_s17   ;;  %s4599_s17 = sphi %s4642_s17, %s20_s17   ;;  %s4595_s16 = sphi %s4640_s16, %s5539_s16   ;;  %s4591_s15 = sphi %s4638_s15, %s5538_s15   ;;  %s4587_s14 = sphi %s4636_s14, %s5537_s14   ;;  %s4583_s13 = sphi %s4634_s13, %s5536_s13   ;;  %s4579_s12 = sphi %s4632_s12, %s5535_s12  }
   0xa   : > { %p69_p0 = scmp.ne.s32.totalorder %s4587_s14, %s4583_s13  ;;  %p70_p1 = scmp.eq.s32.totalorder %s4599_s17, 0 }
   0xb   : > { %p75_p2 = scmp.ne.s32.totalorder %s4583_s13, %s4579_s12  ;;  %p5455_p3 = scmp.eq.s32.totalorder %s4663_s18, 0 }
   0xc   : > { %p120_p4 = scmp.eq.s32.totalorder %s4663_s18, 7  ;;  %p4674_p5 = por %p70_p1, %p69_p0 }
   0xd   : > { %p126_p6 = scmp.eq.s32.totalorder %s3553_s19, 7  ;;  %p4680_p7 = por %p5455_p3, %p75_p2 }
   0xe   : > { %p4684_p8 = por %p120_p4, %p69_p0  ;;  %p3554_p10 = scmp.ge.s32.totalorder %s4599_s17, 1 }
   0xf   : > { %s5463_s22 = scalar_select %p4680_p7, 1, 0 }
  0x10   : > { %s5464_s23 = scalar_select %p4684_p8, 1, 0 }
  0x11   : > { %p4688_p9 = por %p126_p6, %p75_p2  ;;  %p133_p11 = scmp.lt.s32.totalorder %s4599_s17, 9 }
  0x12   : > { %s4601_s26 = smov [#allocation8]   ;;  %p3970_p13 = scmp.lt.s32.totalorder %s4599_s17, 8 }
  0x13   : > { %s5465_s24 = scalar_select %p4688_p9, 1, 0 }
  0x14   : > { %p4694_p12 = pnand %p3554_p10, %p133_p11  ;;  %s159_s27 = sshll.u32 %s4601_s26, 4  ;;  %s160_s27 = int_to_ptr.vmem [resolvable:$true] %s159_s27 }
  0x15   : > { %p4703_p1 = pnand %p3970_p13, %p4674_p5  ;;  %s4602_s30 = smov [#allocation3]  }
  0x16   : > { %s5466_s25 = scalar_select %p4694_p12, 1, 0 }
  0x17   : > { %p3953_p0 = pneg %p4694_p12  ;;  %s145_s4 = sshll.u32 %s4602_s30, 4  ;;  %s146_s4 = int_to_ptr.vmem [resolvable:$true] %s145_s4 }
  0x18   : > { %s5467_s28 = scalar_select %p4703_p1, 1, 0 }
  0x19   : > { %p4709_p2 = pnand %p3953_p0, %p5455_p3  ;;  %s4442_s5 = scalar_lea.vmem %s160_s27, 256 }
  0x1a   : > { %p4443_p6 = scmp.ne.s32.totalorder %s160_s27, %s4442_s5  ;;  %p4450_p11 = scmp.lt.s32.totalorder %s160_s27, %s160_s27 }
  0x1b   : > { %p4433_p4 = pneg %p4709_p2  ;;  %p4451_p13 = scmp.lt.s32.totalorder %s4442_s5, %s4442_s5 }
  0x1d   : > { %p4445_p5 = pnand %p4443_p6, %p4433_p4  ;;  %p4452_p9 = por %p4451_p13, %p4450_p11 }
  0x1f   : > { %p4446_p10 = pneg %p4445_p5 }
  0x21   : > { %p4453_p0 = pnand %p4452_p9, %p4446_p10 }
  0x23   : > { %4456 = shalt.err (!%p4453_p0)
}
  0x24   : > { %s5469_s2 = sld [smem:[#allocation41_spill]]  ;;  %s4468_s8 = scalar_lea.vmem %s146_s4, 13312 }
  0x25   : > { %p4469_p3 = scmp.ne.s32.totalorder %s146_s4, %s4468_s8  ;;  %p4476_p6 = scmp.lt.s32.totalorder %s146_s4, %s146_s4 }
  0x26   : > { %p4477_p5 = scmp.lt.s32.totalorder %s4468_s8, %s4468_s8 }
  0x27   : > { %p4471_p8 = pnand %p4469_p3, %p4433_p4 }
  0x28   : > { %p4478_p12 = por %p4477_p5, %p4476_p6 }
  0x29   : > { %p4472_p7 = pneg %p4471_p8 }
  0x2a   : > { %3959 = dma.hbm_to_vmem [thread:$0]  (!%p4709_p2), %s5469_s2, 256, %s160_s27, [#allocation7]  }
  0x2b   : > { %p4479_p1 = pnand %p4478_p12, %p4472_p7 }
  0x2d   : > { %4482 = shalt.err (!%p4479_p1)
}
  0x2e   : > { %s5460_s9 = smov 1024   ;;  %s4604_s10 = smov 64  }
  0x2f   : > { %3956 = dma.hbm_to_vmem [thread:$0]  (!%p4709_p2), %s5451_s0, 13312, %s146_s4, [#allocation4], %s5460_s9, %s5460_s9, %s4604_s10  }
  0x30   : > { %s170_s21 = sand.u32 1, %s4599_s17   ;;  %s32_s26 = sadd.s32 1, %s4595_s16 }
  0x31   : > { %s172_s27 = sand.u32 1, %s4587_s14   ;;  %p34_p3 = scmp.ge.s32.totalorder %s32_s26, 8 }
  0x32   : > { %s3558_s30 = sshll.u32 %s172_s27, 11  ;;  %s3938_s5 = sshll.u32 %s4595_s16, 7 }
  0x33   : > { %s5541_s26 = smov (%p34_p3, %s32_s26), 0  ;;  %s183_s29 = scalar_lea.hbm %s5452_s1, %s3938_s5 }
  0x34   : > { %s174_s8 = scalar_lea.vmem [#allocation6], %s3558_s30  ;;  %s58_s2 = ssub.s32 %s4595_s16, %s5541_s26 }
  0x35   : > { %s184_s20 = sshll.u32 %s174_s8, 4  ;;  %p60_p7 = scmp.eq.s32.totalorder %s58_s2, 0  ;;  %s185_s20 = int_to_ptr.vmem [resolvable:$true] %s184_s20 }
  0x36   : > { %s5470_s4 = sadd.s32 1, %s4587_s14  ;;  %s171_s11 = scalar_lea.sflag [#allocation7], %s170_s21 }
  0x37   : > { %s4747_s10 = scalar_select %p60_p7, %s4587_s14, %s5470_s4  }
  0x38   : > { %p5471_p8 = scmp.ne.s32.totalorder %s5467_s28, 0  ;;  %s4496_s19 = scalar_lea.vmem %s185_s20, 32768 }
  0x39   : > { %p4497_p12 = scmp.ne.s32.totalorder %s185_s20, %s4496_s19  ;;  %s4605_s27 = smov [#allocation6]  }
  0x3a   : > { %p4485_p9 = pneg %p5471_p8  ;;  %s4501_s9 = sshll.u32 %s4605_s27, 4  ;;  %s4502_s9 = int_to_ptr.vmem [resolvable:$false] %s4501_s9 }
  0x3b   : > { %s4503_s6 = scalar_lea.vmem %s4502_s9, 65536  ;;  %p4504_p4 = scmp.lt.s32.totalorder %s185_s20, %s4502_s9 }
  0x3c   : > { %p4499_p1 = pnand %p4497_p12, %p4485_p9  ;;  %p4505_p10 = scmp.lt.s32.totalorder %s4503_s6, %s4496_s19 }
  0x3e   : > { %p4500_p2 = pneg %p4499_p1  ;;  %p4506_p11 = por %p4505_p10, %p4504_p4 }
  0x40   : > { %p4507_p13 = pnand %p4506_p11, %p4500_p2 }
  0x42   : > { %4510 = shalt.err (!%p4507_p13)
}
  0x43   : > { %s4606_s2 = smov 128   ;;  %s4607_s30 = smov 8  }
  0x44   : > { %s5472_s21 = smov 1024   ;;  %p5473_p0 = scmp.ne.s32.totalorder %s5466_s25, 0 }
  0x45   : > { %3963 = dma.hbm_to_vmem [thread:$0]  (!%p5471_p8), %s183_s29, 32768, %s185_s20, %s171_s11, %s5472_s21, %s4606_s2, %s4607_s30  }
  0x46   : > { %196 = sbr.rel (%p5473_p0) target bundleno = 607 (0x25f), region = 32 }
  0x4b   : > { %p5474_p6 = scmp.eq.s32.totalorder %s4663_s18, 0 }
  0x4d   : > { %4562 = dma.done.wait (%p5474_p6), [#allocation4], 13312   ;;  %p5475_p5 = pmov %p5474_p6 }
  0x4e   : > { %s202_s9 = sand.u32 1, %s4663_s18   ;;  %s4762_s5 = sand.u32 1, %s4583_s13  }
  0x4f   : > { %4564 = vsyncadd (%p5475_p5), [#allocation4], 4294953984  ;;  %s3563_s7 = sshll.u32 %s4762_s5, 11  ;;  %s203_s28 = scalar_lea.sflag [#allocation7], %s202_s9 }
  0x50   : > { %s4765_s8 = scalar_lea.vmem [#allocation6], %s3563_s7  ;;  %p5476_p3 = scmp.ne.s32.totalorder %s5463_s22, 0 }
  0x52   : > { %4566 = dma.done.wait (%p5476_p3), %s203_s28, 32768  }
  0x53   : > { %4568 = vsyncadd (%p5476_p3), %s203_s28, 4294934528  ;;  %p5477_p7 = pmov %p5475_p5 }
  0x54   : > { %p5478_p8 = pmov %p5475_p5 }
  0x55   : > { %4570 = dma.done.wait (%p5477_p7), [#allocation7], 256  }
  0x56   : > { %4572 = vsyncadd (%p5478_p8), [#allocation7], 4294967040  ;;  %v4031_v0 = vld [vmem:[%s4765_s8 + $0x74] ss:$8 sps:$4 sm:$0xff]   ;;  %v4035_v2 = vld [vmem:[%s4765_s8 + $0x70] ss:$8 sps:$4 sm:$0xff]  }
  0x57   : > { %v4033_v1 = vld [vmem:[%s4765_s8 + $0x174] ss:$8 sps:$4 sm:$0xff]   ;;  %2473 = vmatprep.subr.bf16.mxu0 %v4031_v0  ;;  %v4036_v3 = vld [vmem:[%s4765_s8 + $0x170] ss:$8 sps:$4 sm:$0xff]   ;;  %v4037_v4 = vld [vmem:[%s4765_s8 + $0x64] ss:$8 sps:$4 sm:$0xff]  }
  0x58   : > { %2574 = vmatprep.subr.bf16.mxu1 %v4033_v1  ;;  %2474 = vmatpush1.bf16.msra.mxu0 %v4035_v2  ;;  %v4039_v5 = vld [vmem:[%s4765_s8 + $0x164] ss:$8 sps:$4 sm:$0xff]   ;;  %v4041_v6 = vld [vmem:[%s4765_s8 + $0x60] ss:$8 sps:$4 sm:$0xff]   ;;  %v4043_v8 = vld [vmem:[%s4765_s8 + $0x54] ss:$8 sps:$4 sm:$0xff]  }
  0x59   : > { %2575 = vmatpush1.bf16.msra.mxu1 %v4036_v3  ;;  %2475 = vmatprep.subr.bf16.mxu0 %v4037_v4  ;;  %v4042_v7 = vld [vmem:[%s4765_s8 + $0x160] ss:$8 sps:$4 sm:$0xff]   ;;  %v4045_v9 = vld [vmem:[%s4765_s8 + $0x154] ss:$8 sps:$4 sm:$0xff]   ;;  %v4047_v10 = vld [vmem:[%s4765_s8 + $0x50] ss:$8 sps:$4 sm:$0xff]  }
  0x5a   : > { %2576 = vmatprep.subr.bf16.mxu1 %v4039_v5  ;;  %v4048_v11 = vld [vmem:[%s4765_s8 + $0x150] ss:$8 sps:$4 sm:$0xff]   ;;  %v4049_v12 = vld [vmem:[%s4765_s8 + $0x44] ss:$8 sps:$4 sm:$0xff]   ;;  %v4053_v14 = vld [vmem:[%s4765_s8 + $0x40] ss:$8 sps:$4 sm:$0xff]  }
  0x5b   : > { %v4051_v13 = vld [vmem:[%s4765_s8 + $0x144] ss:$8 sps:$4 sm:$0xff]   ;;  %v4054_v15 = vld [vmem:[%s4765_s8 + $0x140] ss:$8 sps:$4 sm:$0xff]   ;;  %v4055_v16 = vld [vmem:[%s4765_s8 + $0x34] ss:$8 sps:$4 sm:$0xff]  }
  0x5c   : > { %2476 = vmatpush1.bf16.msra.mxu0 %v4041_v6  ;;  %v4057_v17 = vld [vmem:[%s4765_s8 + $0x134] ss:$8 sps:$4 sm:$0xff]   ;;  %v4059_v18 = vld [vmem:[%s4765_s8 + $0x30] ss:$8 sps:$4 sm:$0xff]   ;;  %v4061_v20 = vld [vmem:[%s4765_s8 + $0x24] ss:$8 sps:$4 sm:$0xff]  }
  0x5d   : > { %2577 = vmatpush1.bf16.msra.mxu1 %v4042_v7  ;;  %2477 = vmatprep.subr.bf16.mxu0 %v4043_v8  ;;  %v4060_v19 = vld [vmem:[%s4765_s8 + $0x130] ss:$8 sps:$4 sm:$0xff]   ;;  %v4063_v21 = vld [vmem:[%s4765_s8 + $0x124] ss:$8 sps:$4 sm:$0xff]   ;;  %v4065_v22 = vld [vmem:[%s4765_s8 + $0x20] ss:$8 sps:$4 sm:$0xff]  }
  0x5e   : > { %2578 = vmatprep.subr.bf16.mxu1 %v4045_v9  ;;  %v4066_v23 = vld [vmem:[%s4765_s8 + $0x120] ss:$8 sps:$4 sm:$0xff]   ;;  %v4067_v24 = vld [vmem:[%s4765_s8 + $0x14] ss:$8 sps:$4 sm:$0xff]   ;;  %v4071_v26 = vld [vmem:[%s4765_s8 + $0x10] ss:$8 sps:$4 sm:$0xff]  }
  0x5f   : > { %v4069_v25 = vld [vmem:[%s4765_s8 + $0x114] ss:$8 sps:$4 sm:$0xff]   ;;  %v4072_v27 = vld [vmem:[%s4765_s8 + $0x110] ss:$8 sps:$4 sm:$0xff]   ;;  %v4073_v28 = vld [vmem:[%s4765_s8 + $0x4] ss:$8 sps:$4 sm:$0xff]  }
  0x60   : > { %2478 = vmatpush1.bf16.msra.mxu0 %v4047_v10  ;;  %v4075_v29 = vld [vmem:[%s4765_s8 + $0x104] ss:$8 sps:$4 sm:$0xff]   ;;  %v4077_v30 = vld [vmem:[%s4765_s8] ss:$8 sps:$4 sm:$0xff]   ;;  %v4079_v32 = vld [vmem:[%s4765_s8 + $0xf4] ss:$8 sps:$4 sm:$0xff]  }
  0x61   : > { %2579 = vmatpush1.bf16.msra.mxu1 %v4048_v11  ;;  %2479 = vmatprep.subr.bf16.mxu0 %v4049_v12  ;;  %v4078_v31 = vld [vmem:[%s4765_s8 + $0x100] ss:$8 sps:$4 sm:$0xff]   ;;  %v4081_v33 = vld [vmem:[%s4765_s8 + $0x1f4] ss:$8 sps:$4 sm:$0xff]   ;;  %v4083_v34 = vld [vmem:[%s4765_s8 + $0xf0] ss:$8 sps:$4 sm:$0xff]  }
  0x62   : > { %2580 = vmatprep.subr.bf16.mxu1 %v4051_v13  ;;  %v4084_v35 = vld [vmem:[%s4765_s8 + $0x1f0] ss:$8 sps:$4 sm:$0xff]   ;;  %v4085_v36 = vld [vmem:[%s4765_s8 + $0xe4] ss:$8 sps:$4 sm:$0xff]   ;;  %v4089_v38 = vld [vmem:[%s4765_s8 + $0xe0] ss:$8 sps:$4 sm:$0xff]  }
  0x63   : > { %v4087_v37 = vld [vmem:[%s4765_s8 + $0x1e4] ss:$8 sps:$4 sm:$0xff]   ;;  %v4090_v39 = vld [vmem:[%s4765_s8 + $0x1e0] ss:$8 sps:$4 sm:$0xff]   ;;  %v4091_v40 = vld [vmem:[%s4765_s8 + $0xd4] ss:$8 sps:$4 sm:$0xff]  }
  0x64   : > { %2480 = vmatpush1.bf16.msra.mxu0 %v4053_v14  ;;  %v4093_v41 = vld [vmem:[%s4765_s8 + $0x1d4] ss:$8 sps:$4 sm:$0xff]   ;;  %v4095_v42 = vld [vmem:[%s4765_s8 + $0xd0] ss:$8 sps:$4 sm:$0xff]   ;;  %v4097_v44 = vld [vmem:[%s4765_s8 + $0xc4] ss:$8 sps:$4 sm:$0xff]  }
  0x65   : > { %2581 = vmatpush1.bf16.msra.mxu1 %v4054_v15  ;;  %2481 = vmatprep.subr.bf16.mxu0 %v4055_v16  ;;  %v4096_v43 = vld [vmem:[%s4765_s8 + $0x1d0] ss:$8 sps:$4 sm:$0xff]   ;;  %v4099_v45 = vld [vmem:[%s4765_s8 + $0x1c4] ss:$8 sps:$4 sm:$0xff]   ;;  %v4101_v46 = vld [vmem:[%s4765_s8 + $0xc0] ss:$8 sps:$4 sm:$0xff]  }
  0x66   : > { %2582 = vmatprep.subr.bf16.mxu1 %v4057_v17  ;;  %v4102_v47 = vld [vmem:[%s4765_s8 + $0x1c0] ss:$8 sps:$4 sm:$0xff]   ;;  %v4103_v52 = vld [vmem:[%s4765_s8 + $0xb4] ss:$8 sps:$4 sm:$0xff]   ;;  %v4107_v56 = vld [vmem:[%s4765_s8 + $0xb0] ss:$8 sps:$4 sm:$0xff]  }
  0x67   : > { %v271_v48 = vld [vmem:[#allocation3] sm:$0xff]  ;;  %v272_v50 = vld [vmem:[#allocation3 + $0x8] sm:$0xff]  ;;  %v4105_v54 = vld [vmem:[%s4765_s8 + $0x1b4] ss:$8 sps:$4 sm:$0xff]   ;;  %s3933_s18 = sshll.u32 %s4591_s15, 8  ;;  %s3940_s25 = smul.u32 208, %s4762_s5 }
  0x68   : > { %2482 = vmatpush1.bf16.msra.mxu0 %v4059_v18  ;;  %v279_v49 = vld [vmem:[#allocation3 + $0x40] sm:$0xff]  ;;  %v280_v51 = vld [vmem:[#allocation3 + $0x48] sm:$0xff]  ;;  %v4108_v57 = vld [vmem:[%s4765_s8 + $0x1b0] ss:$8 sps:$4 sm:$0xff]   ;;  %s3337_s20 = sshra.s32 %s3933_s18, 7  ;;  %s5397_s27 = scalar_lea.hbm %s5454_s3, %s3933_s18 }
  0x69   : > { %2583 = vmatpush1.bf16.msra.mxu1 %v4060_v19  ;;  %2483 = vmatprep.subr.bf16.mxu0 %v4061_v20  ;;  %v3566_v53 = vcombine.high %v271_v48, %v279_v49  ;;  %v3568_v55 = vcombine.high %v272_v50, %v280_v51  ;;  %v4109_v58 = vld [vmem:[%s4765_s8 + $0xa4] ss:$8 sps:$4 sm:$0xff]   ;;  %v4113_v60 = vld [vmem:[%s4765_s8 + $0xa0] ss:$8 sps:$4 sm:$0xff]   ;;  %v4115_v62 = vld [vmem:[%s4765_s8 + $0x94] ss:$8 sps:$4 sm:$0xff]   ;;  %v3565_v11 = vcombine.low %v271_v48, %v279_v49 }
  0x6a   : > { %2584 = vmatprep.subr.bf16.mxu1 %v4063_v21  ;;  %v4111_v59 = vld [vmem:[%s4765_s8 + $0x1a4] ss:$8 sps:$4 sm:$0xff]   ;;  %v4114_v61 = vld [vmem:[%s4765_s8 + $0x1a0] ss:$8 sps:$4 sm:$0xff]   ;;  %v4117_v63 = vld [vmem:[%s4765_s8 + $0x194] ss:$8 sps:$4 sm:$0xff]   ;;  %v3567_v12 = vcombine.low %v272_v50, %v280_v51 }
  0x6b   : > { %2505 = vmatprep.mubr.bf16.mxu0 %v3566_v53  ;;  %2606 = vmatprep.mubr.bf16.mxu1 %v3568_v55  ;;  %v4119_v0 = vld [vmem:[%s4765_s8 + $0x90] ss:$8 sps:$4 sm:$0xff]   ;;  %v4121_v2 = vld [vmem:[%s4765_s8 + $0x84] ss:$8 sps:$4 sm:$0xff]   ;;  %v4125_v4 = vld [vmem:[%s4765_s8 + $0x80] ss:$8 sps:$4 sm:$0xff]  }
  0x6c   : > { %2484 = vmatpush1.bf16.msra.mxu0 %v4065_v22  ;;  %v4120_v1 = vld [vmem:[%s4765_s8 + $0x190] ss:$8 sps:$4 sm:$0xff]   ;;  %v4123_v3 = vld [vmem:[%s4765_s8 + $0x184] ss:$8 sps:$4 sm:$0xff]   ;;  %v4126_v5 = vld [vmem:[%s4765_s8 + $0x180] ss:$8 sps:$4 sm:$0xff]  }
  0x6d   : > { %2585 = vmatpush1.bf16.msra.mxu1 %v4066_v23  ;;  %2485 = vmatprep.subr.bf16.mxu0 %v4067_v24  ;;  %v4129_v6 = vld [vmem:[%s4765_s8 + $0x274] ss:$8 sps:$4 sm:$0xff]   ;;  %v4127_v8 = vld [vmem:[%s4765_s8 + $0x270] ss:$8 sps:$4 sm:$0xff]   ;;  %v287_v9 = vld [vmem:[#allocation3 + $0x80] sm:$0xff]  ;;  %s3339_s22 = scalar_lea.vmem [#allocation8], %s3337_s20 }
  0x6e   : > { %2586 = vmatprep.subr.bf16.mxu1 %v4069_v25  ;;  %v4132_v7 = vld [vmem:[%s4765_s8 + $0x374] ss:$8 sps:$4 sm:$0xff]   ;;  %v295_v10 = vld [vmem:[#allocation3 + $0xc0] sm:$0xff]  ;;  %v288_v13 = vld [vmem:[#allocation3 + $0x88] sm:$0xff]  ;;  %s5284_s29 = scalar_lea.vmem [#allocation9], %s3940_s25  ;;  %s3431_s15 = scalar_lea.sflag [#allocation5], %s4762_s5 }
  0x6f   : > { %v296_v14 = vld [vmem:[#allocation3 + $0xc8] sm:$0xff]  ;;  %v4130_v15 = vld [vmem:[%s4765_s8 + $0x370] ss:$8 sps:$4 sm:$0xff]   ;;  %v3582_v18 = vcombine.high %v287_v9, %v295_v10  ;;  %v4141_v22 = vld [vmem:[%s4765_s8 + $0x254] ss:$8 sps:$4 sm:$0xff]   ;;  %s3444_s4 = sshll.u32 %s5284_s29, 4  ;;  %s5401_s4 = int_to_ptr.vmem [resolvable:$true] %s3444_s4 }
  0x70   : > { %2486 = vmatpush1.bf16.msra.mxu0 %v4071_v26  ;;  %v4135_v16 = vld [vmem:[%s4765_s8 + $0x264] ss:$8 sps:$4 sm:$0xff]   ;;  %v3584_v19 = vcombine.high %v288_v13, %v296_v14  ;;  %v4133_v20 = vld [vmem:[%s4765_s8 + $0x260] ss:$8 sps:$4 sm:$0xff]   ;;  %v4144_v23 = vld [vmem:[%s4765_s8 + $0x354] ss:$8 sps:$4 sm:$0xff]   ;;  %v3581_v26 = vcombine.low %v287_v9, %v295_v10 }
  0x71   : > { %2587 = vmatpush1.bf16.msra.mxu1 %v4072_v27  ;;  %2487 = vmatprep.subr.bf16.mxu0 %v4073_v28  ;;  %v4138_v17 = vld [vmem:[%s4765_s8 + $0x364] ss:$8 sps:$4 sm:$0xff]   ;;  %v4136_v21 = vld [vmem:[%s4765_s8 + $0x360] ss:$8 sps:$4 sm:$0xff]   ;;  %v3583_v27 = vcombine.low %v288_v13, %v296_v14  ;;  %v4168_v55 = vld [vmem:[%s4765_s8 + $0x314] ss:$8 sps:$4 sm:$0xff]  }
  0x72   : > { %2588 = vmatprep.subr.bf16.mxu1 %v4075_v29  ;;  %v303_v24 = vld [vmem:[#allocation3 + $0x100] sm:$0xff]  ;;  %v304_v28 = vld [vmem:[#allocation3 + $0x108] sm:$0xff]  ;;  %v4175_v14 = vld [vmem:[%s4765_s8 + $0x2f0] ss:$8 sps:$4 sm:$0xff]   ;;  %s4511_s6 = scalar_lea.vmem %s5401_s4, 3328  ;;  %p5533_p12 = scmp.ne.s32.totalorder %s5464_s23, 0 }
  0x73   : > { %v311_v25 = vld [vmem:[#allocation3 + $0x140] sm:$0xff]  ;;  %v312_v29 = vld [vmem:[#allocation3 + $0x148] sm:$0xff]  ;;  %p4512_p9 = scmp.ne.s32.totalorder %s5401_s4, %s4511_s6  ;;  %s4608_s2 = smov [#allocation9]  }
  0x74   : > { %2488 = vmatpush1.bf16.msra.mxu0 %v4077_v30  ;;  %v4139_v30 = vld [vmem:[%s4765_s8 + $0x250] ss:$8 sps:$4 sm:$0xff]   ;;  %v4159_v48 = vld [vmem:[%s4765_s8 + $0x224] ss:$8 sps:$4 sm:$0xff]   ;;  %v4160_v53 = vld [vmem:[%s4765_s8 + $0x320] ss:$8 sps:$4 sm:$0xff]  }
  0x75   : > { %2589 = vmatpush1.bf16.msra.mxu1 %v4078_v31  ;;  %2489 = vmatprep.subr.bf16.mxu0 %v4079_v32  ;;  %v4142_v31 = vld [vmem:[%s4765_s8 + $0x350] ss:$8 sps:$4 sm:$0xff]   ;;  %v4147_v32 = vld [vmem:[%s4765_s8 + $0x244] ss:$8 sps:$4 sm:$0xff]   ;;  %p4513_p1 = pnand %p4512_p9, %p5533_p12  ;;  %s4515_s30 = sshll.u32 %s4608_s2, 4  ;;  %s4516_s30 = int_to_ptr.vmem [resolvable:$false] %s4515_s30 }
  0x76   : > { %2590 = vmatprep.subr.bf16.mxu1 %v4081_v33  ;;  %v4150_v33 = vld [vmem:[%s4765_s8 + $0x344] ss:$8 sps:$4 sm:$0xff]   ;;  %s4517_s21 = scalar_lea.vmem %s4516_s30, 6656  ;;  %p4518_p4 = scmp.lt.s32.totalorder %s5401_s4, %s4516_s30 }
  0x77   : > { %v4162_v49 = vld [vmem:[%s4765_s8 + $0x324] ss:$8 sps:$4 sm:$0xff]   ;;  %p4514_p2 = pneg %p4513_p1  ;;  %p4519_p10 = scmp.lt.s32.totalorder %s4517_s21, %s4511_s6 }
  0x78   : > { %2490 = vmatpush2.bf16.msra.mxu0 %v4083_v34  ;;  %v3598_v34 = vcombine.high %v303_v24, %v311_v25  ;;  %v359_v9 = vld [vmem:[#allocation3 + $0x2c0] sm:$0xff]  ;;  %v352_v10 = vld [vmem:[#allocation3 + $0x288] sm:$0xff] }
  0x79   : > { %2591 = vmatpush2.bf16.msra.mxu1 %v4084_v35  ;;  %2491 = vmatprep.subr.bf16.mxu0 %v4085_v36  ;;  %v3600_v35 = vcombine.high %v304_v28, %v312_v29  ;;  %v4145_v36 = vld [vmem:[%s4765_s8 + $0x240] ss:$8 sps:$4 sm:$0xff]   ;;  %p4520_p11 = por %p4519_p10, %p4518_p4 }
  0x7a   : > { %2592 = vmatprep.subr.bf16.mxu1 %v4087_v37  ;;  %v4148_v37 = vld [vmem:[%s4765_s8 + $0x340] ss:$8 sps:$4 sm:$0xff]  }
  0x7b   : > { %v360_v13 = vld [vmem:[#allocation3 + $0x2c8] sm:$0xff]  ;;  %p4521_p13 = pnand %p4520_p11, %p4514_p2 }
  0x7c   : > { %2492 = vmatpush2.bf16.msra.mxu0 %v4089_v38  ;;  %v4153_v38 = vld [vmem:[%s4765_s8 + $0x234] ss:$8 sps:$4 sm:$0xff]  }
  0x7d   : > { %2593 = vmatpush2.bf16.msra.mxu1 %v4090_v39  ;;  %2493 = vmatprep.subr.bf16.mxu0 %v4091_v40  ;;  %v4156_v39 = vld [vmem:[%s4765_s8 + $0x334] ss:$8 sps:$4 sm:$0xff]   ;;  %v4151_v40 = vld [vmem:[%s4765_s8 + $0x230] ss:$8 sps:$4 sm:$0xff]  }
  0x7e   : > { %2594 = vmatprep.subr.bf16.mxu1 %v4093_v41  ;;  %v4154_v41 = vld [vmem:[%s4765_s8 + $0x330] ss:$8 sps:$4 sm:$0xff]  }
  0x80   : > { %2494 = vmatpush2.bf16.msra.mxu0 %v4095_v42  ;;  %v319_v42 = vld [vmem:[#allocation3 + $0x180] sm:$0xff] }
  0x81   : > { %2595 = vmatpush2.bf16.msra.mxu1 %v4096_v43  ;;  %2495 = vmatprep.subr.bf16.mxu0 %v4097_v44  ;;  %v3597_v43 = vcombine.low %v303_v24, %v311_v25  ;;  %v3599_v44 = vcombine.low %v304_v28, %v312_v29  ;;  %v3647_v25 = vcombine.low %v352_v10, %v360_v13  ;;  %v4187_v28 = vld [vmem:[%s4765_s8 + $0x2d0] ss:$8 sps:$4 sm:$0xff]  }
  0x82   : > { %2596 = vmatprep.subr.bf16.mxu1 %v4099_v45  ;;  %v327_v45 = vld [vmem:[#allocation3 + $0x1c0] sm:$0xff]  ;;  %v4190_v29 = vld [vmem:[%s4765_s8 + $0x3d0] ss:$8 sps:$4 sm:$0xff]  }
  0x83   : > { %v3614_v50 = vcombine.high %v319_v42, %v327_v45 }
  0x84   : > { %2496 = vmatpush2.bf16.msra.mxu0 %v4101_v46  ;;  %v320_v46 = vld [vmem:[#allocation3 + $0x188] sm:$0xff] }
  0x85   : > { %2597 = vmatpush2.bf16.msra.mxu1 %v4102_v47  ;;  %2497 = vmatprep.subr.bf16.mxu0 %v4103_v52  ;;  %v328_v47 = vld [vmem:[#allocation3 + $0x1c8] sm:$0xff] }
  0x86   : > { %2598 = vmatprep.subr.bf16.mxu1 %v4105_v54  ;;  %v3616_v51 = vcombine.high %v320_v46, %v328_v47  ;;  %v4157_v52 = vld [vmem:[%s4765_s8 + $0x220] ss:$8 sps:$4 sm:$0xff]   ;;  %v4165_v54 = vld [vmem:[%s4765_s8 + $0x214] ss:$8 sps:$4 sm:$0xff]  }
  0x88   : > { %2498 = vmatpush2.bf16.msra.mxu0 %v4107_v56  ;;  %v335_v56 = vld [vmem:[#allocation3 + $0x200] sm:$0xff] }
  0x89   : > { %2599 = vmatpush2.bf16.msra.mxu1 %v4108_v57  ;;  %2499 = vmatprep.subr.bf16.mxu0 %v4109_v58  ;;  %v343_v57 = vld [vmem:[#allocation3 + $0x240] sm:$0xff]  ;;  %v336_v58 = vld [vmem:[#allocation3 + $0x208] sm:$0xff] }
  0x8a   : > { %2600 = vmatprep.subr.bf16.mxu1 %v4111_v59  ;;  %v3613_v59 = vcombine.low %v319_v42, %v327_v45  ;;  %v4202_v45 = vld [vmem:[%s4765_s8 + $0x3b0] ss:$8 sps:$4 sm:$0xff]  }
  0x8c   : > { %2500 = vmatpush2.bf16.msra.mxu0 %v4113_v60  ;;  %v3615_v60 = vcombine.low %v320_v46, %v328_v47  ;;  %v4210_v46 = vld [vmem:[%s4765_s8 + $0x2a4] ss:$8 sps:$4 sm:$0xff]  }
  0x8d   : > { %2601 = vmatpush2.bf16.msra.mxu1 %v4114_v61  ;;  %2501 = vmatprep.subr.bf16.mxu0 %v4115_v62  ;;  %v344_v61 = vld [vmem:[#allocation3 + $0x248] sm:$0xff]  ;;  %v4163_v62 = vld [vmem:[%s4765_s8 + $0x210] ss:$8 sps:$4 sm:$0xff]  }
  0x8e   : > { %2602 = vmatprep.subr.bf16.mxu1 %v4117_v63  ;;  %v4166_v63 = vld [vmem:[%s4765_s8 + $0x310] ss:$8 sps:$4 sm:$0xff]   ;;  %v4213_v47 = vld [vmem:[%s4765_s8 + $0x3a4] ss:$8 sps:$4 sm:$0xff]  }
  0x90   : > { %2502 = vmatpush2.bf16.msra.mxu0 %v4119_v0  ;;  %v4171_v0 = vld [vmem:[%s4765_s8 + $0x204] ss:$8 sps:$4 sm:$0xff]  }
  0x91   : > { %2603 = vmatpush2.bf16.msra.mxu1 %v4120_v1  ;;  %2503 = vmatprep.subr.bf16.mxu0 %v4121_v2  ;;  %v4174_v1 = vld [vmem:[%s4765_s8 + $0x304] ss:$8 sps:$4 sm:$0xff]   ;;  %v3630_v2 = vcombine.high %v335_v56, %v343_v57 }
  0x92   : > { %2604 = vmatprep.subr.bf16.mxu1 %v4123_v3  ;;  %v3632_v3 = vcombine.high %v336_v58, %v344_v61 }
  0x94   : > { %2504 = vmatpush2.bf16.msra.mxu0 %v4125_v4  ;;  %v4169_v4 = vld [vmem:[%s4765_s8 + $0x200] ss:$8 sps:$4 sm:$0xff]  }
  0x95   : > { %2605 = vmatpush2.bf16.msra.mxu1 %v4126_v5  ;;  %2675 = vmatprep.subr.bf16.mxu0 %v4129_v6  ;;  %v4172_v5 = vld [vmem:[%s4765_s8 + $0x300] ss:$8 sps:$4 sm:$0xff]   ;;  %v4177_v6 = vld [vmem:[%s4765_s8 + $0x2f4] ss:$8 sps:$4 sm:$0xff]  }
  0x96   : > { %2776 = vmatprep.subr.bf16.mxu1 %v4132_v7  ;;  %v4180_v7 = vld [vmem:[%s4765_s8 + $0x3f4] ss:$8 sps:$4 sm:$0xff]  }
  0x97   : > { %2506 = vmatmul.mubr.bf16.vlgmr.msra.gmra.mxu0 %v3565_v11  ;;  %v3629_v11 = vcombine.low %v335_v56, %v343_v57  ;;  %v4223_v56 = vld [vmem:[%s4765_s8 + $0x284] ss:$8 sps:$4 sm:$0xff]  }
  0x98   : > { %2607 = vmatmul.mubr.bf16.vlgmr.msra.gmra.mxu1 %v3567_v12  ;;  %2676 = vmatpush1.bf16.msra.mxu0 %v4127_v8  ;;  %v351_v8 = vld [vmem:[#allocation3 + $0x280] sm:$0xff]  ;;  %v3631_v12 = vcombine.low %v336_v58, %v344_v61  ;;  %v4232_v61 = vld [vmem:[%s4765_s8 + $0x574] ss:$8 sps:$4 sm:$0xff]  }
  0x99   : > { %2777 = vmatpush1.bf16.msra.mxu1 %v4130_v15  ;;  %2677 = vmatprep.subr.bf16.mxu0 %v4135_v16  ;;  %v4178_v15 = vld [vmem:[%s4765_s8 + $0x3f0] ss:$8 sps:$4 sm:$0xff]   ;;  %v4183_v16 = vld [vmem:[%s4765_s8 + $0x2e4] ss:$8 sps:$4 sm:$0xff]   ;;  %v3645_v24 = vcombine.low %v351_v8, %v359_v9  ;;  %v4221_v58 = vld [vmem:[%s4765_s8 + $0x280] ss:$8 sps:$4 sm:$0xff]  }
  0x9a   : > { %2778 = vmatprep.subr.bf16.mxu1 %v4138_v17  ;;  %2515 = vmatprep.mubr.bf16.mxu0 %v3582_v18  ;;  %v4186_v17 = vld [vmem:[%s4765_s8 + $0x3e4] ss:$8 sps:$4 sm:$0xff]   ;;  %v3646_v18 = vcombine.high %v351_v8, %v359_v9 }
  0x9b   : > { %2616 = vmatprep.mubr.bf16.mxu1 %v3584_v19  ;;  %v3648_v19 = vcombine.high %v352_v10, %v360_v13  ;;  %v4226_v57 = vld [vmem:[%s4765_s8 + $0x384] ss:$8 sps:$4 sm:$0xff]   ;;  %v4233_v10 = vld [vmem:[%s4765_s8 + $0x460] ss:$8 sps:$4 sm:$0xff]   ;;  %v4244_v13 = vld [vmem:[%s4765_s8 + $0x554] ss:$8 sps:$4 sm:$0xff]  }
  0x9c   : > { %2678 = vmatpush1.bf16.msra.mxu0 %v4133_v20  ;;  %v4181_v20 = vld [vmem:[%s4765_s8 + $0x2e0] ss:$8 sps:$4 sm:$0xff]  }
  0x9d   : > { %2779 = vmatpush1.bf16.msra.mxu1 %v4136_v21  ;;  %2679 = vmatprep.subr.bf16.mxu0 %v4141_v22  ;;  %v4184_v21 = vld [vmem:[%s4765_s8 + $0x3e0] ss:$8 sps:$4 sm:$0xff]   ;;  %v4189_v22 = vld [vmem:[%s4765_s8 + $0x2d4] ss:$8 sps:$4 sm:$0xff]  }
  0x9e   : > { %2780 = vmatprep.subr.bf16.mxu1 %v4144_v23  ;;  %v4192_v23 = vld [vmem:[%s4765_s8 + $0x3d4] ss:$8 sps:$4 sm:$0xff]  }
  0x9f   : > { %2516 = vmatmul.mubr.bf16.gmra.mxu0 %v3581_v26  ;;  %v367_v26 = vld [vmem:[#allocation3 + $0x300] sm:$0xff] }
  0xa0   : > { %2617 = vmatmul.mubr.bf16.gmra.mxu1 %v3583_v27  ;;  %2680 = vmatpush1.bf16.msra.mxu0 %v4139_v30  ;;  %v368_v27 = vld [vmem:[#allocation3 + $0x308] sm:$0xff] }
  0xa1   : > { %2781 = vmatpush1.bf16.msra.mxu1 %v4142_v31  ;;  %2681 = vmatprep.subr.bf16.mxu0 %v4147_v32  ;;  %v4195_v30 = vld [vmem:[%s4765_s8 + $0x2c4] ss:$8 sps:$4 sm:$0xff]   ;;  %v3662_v32 = vcombine.high %v367_v26, %v367_v26  ;;  %v3663_v42 = vcombine.low %v368_v27, %v368_v27 }
  0xa2   : > { %2782 = vmatprep.subr.bf16.mxu1 %v4150_v33  ;;  %2525 = vmatprep.mubr.bf16.mxu0 %v3598_v34  ;;  %v4198_v31 = vld [vmem:[%s4765_s8 + $0x3c4] ss:$8 sps:$4 sm:$0xff]   ;;  %v3664_v33 = vcombine.high %v368_v27, %v368_v27  ;;  %v4193_v34 = vld [vmem:[%s4765_s8 + $0x2c0] ss:$8 sps:$4 sm:$0xff]  }
  0xa3   : > { %2626 = vmatprep.mubr.bf16.mxu1 %v3600_v35  ;;  %v4196_v35 = vld [vmem:[%s4765_s8 + $0x3c0] ss:$8 sps:$4 sm:$0xff]  }
  0xa4   : > { %2682 = vmatpush1.bf16.msra.mxu0 %v4145_v36  ;;  %v4201_v36 = vld [vmem:[%s4765_s8 + $0x2b4] ss:$8 sps:$4 sm:$0xff]   ;;  %v4248_v27 = vld [vmem:[%s4765_s8 + $0x540] ss:$8 sps:$4 sm:$0xff]  }
  0xa5   : > { %2783 = vmatpush1.bf16.msra.mxu1 %v4148_v37  ;;  %2683 = vmatprep.subr.bf16.mxu0 %v4153_v38  ;;  %v4204_v37 = vld [vmem:[%s4765_s8 + $0x3b4] ss:$8 sps:$4 sm:$0xff]  }
  0xa6   : > { %2784 = vmatprep.subr.bf16.mxu1 %v4156_v39  ;;  %v273_v38 = vld [vmem:[#allocation3 + $0x10] sm:$0xff] }
  0xa7   : > { %2526 = vmatmul.mubr.bf16.gmra.mxu0 %v3597_v43  ;;  %v281_v39 = vld [vmem:[#allocation3 + $0x50] sm:$0xff]  ;;  %v282_v43 = vld [vmem:[#allocation3 + $0x58] sm:$0xff] }
  0xa8   : > { %2627 = vmatmul.mubr.bf16.gmra.mxu1 %v3599_v44  ;;  %2684 = vmatpush1.bf16.msra.mxu0 %v4151_v40  ;;  %v274_v40 = vld [vmem:[#allocation3 + $0x18] sm:$0xff] }
  0xa9   : > { %2785 = vmatpush1.bf16.msra.mxu1 %v4154_v41  ;;  %2685 = vmatprep.subr.bf16.mxu0 %v4159_v48  ;;  %v3661_v41 = vcombine.low %v367_v26, %v367_v26  ;;  %v4199_v44 = vld [vmem:[%s4765_s8 + $0x2b0] ss:$8 sps:$4 sm:$0xff]   ;;  %v3570_v48 = vcombine.high %v273_v38, %v281_v39  ;;  %v4245_v26 = vld [vmem:[%s4765_s8 + $0x440] ss:$8 sps:$4 sm:$0xff]  }
  0xaa   : > { %2786 = vmatprep.subr.bf16.mxu1 %v4162_v49  ;;  %2535 = vmatprep.mubr.bf16.mxu0 %v3614_v50  ;;  %v3572_v49 = vcombine.high %v274_v40, %v282_v43  ;;  %v4208_v50 = vld [vmem:[%s4765_s8 + $0x2a0] ss:$8 sps:$4 sm:$0xff]  }
  0xab   : > { %2636 = vmatprep.mubr.bf16.mxu1 %v3616_v51  ;;  %v4211_v51 = vld [vmem:[%s4765_s8 + $0x3a0] ss:$8 sps:$4 sm:$0xff]  }
  0xac   : > { %2686 = vmatpush1.bf16.msra.mxu0 %v4157_v52  ;;  %v4217_v52 = vld [vmem:[%s4765_s8 + $0x294] ss:$8 sps:$4 sm:$0xff]  }
  0xad   : > { %2787 = vmatpush1.bf16.msra.mxu1 %v4160_v53  ;;  %2687 = vmatprep.subr.bf16.mxu0 %v4165_v54  ;;  %v4220_v53 = vld [vmem:[%s4765_s8 + $0x394] ss:$8 sps:$4 sm:$0xff]   ;;  %v4215_v54 = vld [vmem:[%s4765_s8 + $0x290] ss:$8 sps:$4 sm:$0xff]  }
  0xae   : > { %2788 = vmatprep.subr.bf16.mxu1 %v4168_v55  ;;  %v4218_v55 = vld [vmem:[%s4765_s8 + $0x390] ss:$8 sps:$4 sm:$0xff]  }
  0xaf   : > { %2536 = vmatmul.mubr.bf16.gmra.mxu0 %v3613_v59  ;;  %v4224_v59 = vld [vmem:[%s4765_s8 + $0x380] ss:$8 sps:$4 sm:$0xff]  }
  0xb0   : > { %2637 = vmatmul.mubr.bf16.gmra.mxu1 %v3615_v60  ;;  %2688 = vmatpush1.bf16.msra.mxu0 %v4163_v62  ;;  %v4229_v60 = vld [vmem:[%s4765_s8 + $0x474] ss:$8 sps:$4 sm:$0xff]   ;;  %v4227_v62 = vld [vmem:[%s4765_s8 + $0x470] ss:$8 sps:$4 sm:$0xff]  }
  0xb1   : > { %2789 = vmatpush1.bf16.msra.mxu1 %v4166_v63  ;;  %2689 = vmatprep.subr.bf16.mxu0 %v4171_v0  ;;  %v4230_v63 = vld [vmem:[%s4765_s8 + $0x570] ss:$8 sps:$4 sm:$0xff]  }
  0xb2   : > { %2790 = vmatprep.subr.bf16.mxu1 %v4174_v1  ;;  %2545 = vmatprep.mubr.bf16.mxu0 %v3630_v2  ;;  %v289_v0 = vld [vmem:[#allocation3 + $0x90] sm:$0xff]  ;;  %v3569_v1 = vcombine.low %v273_v38, %v281_v39  ;;  %v3571_v2 = vcombine.low %v274_v40, %v282_v43  ;;  %v4259_v38 = vld [vmem:[%s4765_s8 + $0x424] ss:$8 sps:$4 sm:$0xff]   ;;  %v4260_v43 = vld [vmem:[%s4765_s8 + $0x520] ss:$8 sps:$4 sm:$0xff]  }
  0xb3   : > { %2646 = vmatprep.mubr.bf16.mxu1 %v3632_v3  ;;  %v297_v3 = vld [vmem:[#allocation3 + $0xd0] sm:$0xff]  ;;  %v4262_v39 = vld [vmem:[%s4765_s8 + $0x524] ss:$8 sps:$4 sm:$0xff]  }
  0xb4   : > { %2690 = vmatpush1.bf16.msra.mxu0 %v4169_v4  ;;  %v290_v4 = vld [vmem:[#allocation3 + $0x98] sm:$0xff]  ;;  %v3586_v8 = vcombine.high %v289_v0, %v297_v3 }
  0xb5   : > { %2791 = vmatpush1.bf16.msra.mxu1 %v4172_v5  ;;  %2691 = vmatprep.subr.bf16.mxu0 %v4177_v6  ;;  %v298_v5 = vld [vmem:[#allocation3 + $0xd8] sm:$0xff]  ;;  %v4235_v6 = vld [vmem:[%s4765_s8 + $0x464] ss:$8 sps:$4 sm:$0xff]  }
  0xb6   : > { %2792 = vmatprep.subr.bf16.mxu1 %v4180_v7  ;;  %v4238_v7 = vld [vmem:[%s4765_s8 + $0x564] ss:$8 sps:$4 sm:$0xff]   ;;  %v3588_v9 = vcombine.high %v290_v4, %v298_v5 }
  0xb7   : > { %2546 = vmatmul.mubr.bf16.gmra.mxu0 %v3629_v11  ;;  %v4236_v11 = vld [vmem:[%s4765_s8 + $0x560] ss:$8 sps:$4 sm:$0xff]  }
  0xb8   : > { %2647 = vmatmul.mubr.bf16.gmra.mxu1 %v3631_v12  ;;  %2692 = vmatpush2.bf16.msra.mxu0 %v4175_v14  ;;  %v4241_v12 = vld [vmem:[%s4765_s8 + $0x454] ss:$8 sps:$4 sm:$0xff]  }
  0xb9   : > { %2793 = vmatpush2.bf16.msra.mxu1 %v4178_v15  ;;  %2693 = vmatprep.subr.bf16.mxu0 %v4183_v16  ;;  %v305_v14 = vld [vmem:[#allocation3 + $0x110] sm:$0xff] }
  0xba   : > { %2794 = vmatprep.subr.bf16.mxu1 %v4186_v17  ;;  %2555 = vmatprep.mubr.bf16.mxu0 %v3646_v18  ;;  %v4239_v15 = vld [vmem:[%s4765_s8 + $0x450] ss:$8 sps:$4 sm:$0xff]   ;;  %v3585_v17 = vcombine.low %v289_v0, %v297_v3  ;;  %v3587_v18 = vcombine.low %v290_v4, %v298_v5 }
  0xbb   : > { %2656 = vmatprep.mubr.bf16.mxu1 %v3648_v19  ;;  %v313_v16 = vld [vmem:[#allocation3 + $0x150] sm:$0xff]  ;;  %v306_v19 = vld [vmem:[#allocation3 + $0x118] sm:$0xff] }
  0xbc   : > { %2694 = vmatpush2.bf16.msra.mxu0 %v4181_v20  ;;  %v314_v20 = vld [vmem:[#allocation3 + $0x158] sm:$0xff] }
  0xbd   : > { %2795 = vmatpush2.bf16.msra.mxu1 %v4184_v21  ;;  %2695 = vmatprep.subr.bf16.mxu0 %v4189_v22  ;;  %v4242_v21 = vld [vmem:[%s4765_s8 + $0x550] ss:$8 sps:$4 sm:$0xff]   ;;  %v4247_v22 = vld [vmem:[%s4765_s8 + $0x444] ss:$8 sps:$4 sm:$0xff]  }
  0xbe   : > { %2796 = vmatprep.subr.bf16.mxu1 %v4192_v23  ;;  %v4250_v23 = vld [vmem:[%s4765_s8 + $0x544] ss:$8 sps:$4 sm:$0xff]   ;;  %v354_v0 = vld [vmem:[#allocation3 + $0x298] sm:$0xff] }
  0xbf   : > { %2556 = vmatmul.mubr.bf16.gmra.mxu0 %v3645_v24  ;;  %v3602_v24 = vcombine.high %v305_v14, %v313_v16  ;;  %v362_v3 = vld [vmem:[#allocation3 + $0x2d8] sm:$0xff] }
  0xc0   : > { %2657 = vmatmul.mubr.bf16.gmra.mxu1 %v3647_v25  ;;  %2696 = vmatpush2.bf16.msra.mxu0 %v4187_v28  ;;  %v3604_v25 = vcombine.high %v306_v19, %v314_v20  ;;  %v4253_v28 = vld [vmem:[%s4765_s8 + $0x434] ss:$8 sps:$4 sm:$0xff]   ;;  %v4275_v4 = vld [vmem:[%s4765_s8 + $0x4f0] ss:$8 sps:$4 sm:$0xff]  }
  0xc1   : > { %2797 = vmatpush2.bf16.msra.mxu1 %v4190_v29  ;;  %2697 = vmatprep.subr.bf16.mxu0 %v4195_v30  ;;  %v4256_v29 = vld [vmem:[%s4765_s8 + $0x534] ss:$8 sps:$4 sm:$0xff]   ;;  %v4251_v30 = vld [vmem:[%s4765_s8 + $0x430] ss:$8 sps:$4 sm:$0xff]  }
  0xc2   : > { %2798 = vmatprep.subr.bf16.mxu1 %v4198_v31  ;;  %2565 = vmatprep.mubr.bf16.mxu0 %v3662_v32  ;;  %v321_v31 = vld [vmem:[#allocation3 + $0x190] sm:$0xff] }
  0xc3   : > { %2666 = vmatprep.mubr.bf16.mxu1 %v3664_v33  ;;  %v329_v32 = vld [vmem:[#allocation3 + $0x1d0] sm:$0xff]  ;;  %v3601_v33 = vcombine.low %v305_v14, %v313_v16  ;;  %v3651_v16 = vcombine.low %v354_v0, %v362_v3 }
  0xc4   : > { %2698 = vmatpush2.bf16.msra.mxu0 %v4193_v34  ;;  %v3603_v34 = vcombine.low %v306_v19, %v314_v20  ;;  %v3618_v40 = vcombine.high %v321_v31, %v329_v32  ;;  %v4278_v5 = vld [vmem:[%s4765_s8 + $0x5f0] ss:$8 sps:$4 sm:$0xff]   ;;  %v4295_v20 = vld [vmem:[%s4765_s8 + $0x4c4] ss:$8 sps:$4 sm:$0xff]  }
  0xc5   : > { %2799 = vmatpush2.bf16.msra.mxu1 %v4196_v35  ;;  %2699 = vmatprep.subr.bf16.mxu0 %v4201_v36  ;;  %v322_v35 = vld [vmem:[#allocation3 + $0x198] sm:$0xff]  ;;  %v369_v14 = vld [vmem:[#allocation3 + $0x310] sm:$0xff] }
  0xc6   : > { %2800 = vmatprep.subr.bf16.mxu1 %v4204_v37  ;;  %v330_v36 = vld [vmem:[#allocation3 + $0x1d8] sm:$0xff] }
  0xc7   : > { %2566 = vmatmul.mubr.bf16.gmra.mxu0 %v3661_v41  ;;  %v4254_v37 = vld [vmem:[%s4765_s8 + $0x530] ss:$8 sps:$4 sm:$0xff]   ;;  %v3620_v41 = vcombine.high %v322_v35, %v330_v36 }
  0xc8   : > { %2667 = vmatmul.mubr.bf16.gmra.mxu1 %v3663_v42  ;;  %2700 = vmatpush2.bf16.msra.mxu0 %v4199_v44  ;;  %v4257_v42 = vld [vmem:[%s4765_s8 + $0x420] ss:$8 sps:$4 sm:$0xff]   ;;  %v4265_v44 = vld [vmem:[%s4765_s8 + $0x414] ss:$8 sps:$4 sm:$0xff]   ;;  %v4290_v19 = vld [vmem:[%s4765_s8 + $0x5d0] ss:$8 sps:$4 sm:$0xff]  }
  0xc9   : > { %2801 = vmatpush2.bf16.msra.mxu1 %v4202_v45  ;;  %2701 = vmatprep.subr.bf16.mxu0 %v4210_v46  ;;  %v4268_v45 = vld [vmem:[%s4765_s8 + $0x514] ss:$8 sps:$4 sm:$0xff]  }
  0xca   : > { %2802 = vmatprep.subr.bf16.mxu1 %v4213_v47  ;;  %2707 = vmatprep.mubr.bf16.mxu0 %v3570_v48  ;;  %v337_v46 = vld [vmem:[#allocation3 + $0x210] sm:$0xff]  ;;  %v3617_v48 = vcombine.low %v321_v31, %v329_v32  ;;  %v3665_v31 = vcombine.low %v369_v14, %v369_v14 }
  0xcb   : > { %2808 = vmatprep.mubr.bf16.mxu1 %v3572_v49  ;;  %v345_v47 = vld [vmem:[#allocation3 + $0x250] sm:$0xff]  ;;  %v3619_v49 = vcombine.low %v322_v35, %v330_v36  ;;  %v284_v35 = vld [vmem:[#allocation3 + $0x68] sm:$0xff] }
  0xcc   : > { %2702 = vmatpush2.bf16.msra.mxu0 %v4208_v50  ;;  %v338_v50 = vld [vmem:[#allocation3 + $0x218] sm:$0xff]  ;;  %v4311_v36 = vld [vmem:[%s4765_s8 + $0x4a4] ss:$8 sps:$4 sm:$0xff]  }
  0xcd   : > { %2803 = vmatpush2.bf16.msra.mxu1 %v4211_v51  ;;  %2703 = vmatprep.subr.bf16.mxu0 %v4217_v52  ;;  %v346_v51 = vld [vmem:[#allocation3 + $0x258] sm:$0xff] }
  0xce   : > { %2804 = vmatprep.subr.bf16.mxu1 %v4220_v53  ;;  %v4263_v52 = vld [vmem:[%s4765_s8 + $0x410] ss:$8 sps:$4 sm:$0xff]  }
  0xcf   : > { %v4266_v53 = vld [vmem:[%s4765_s8 + $0x510] ss:$8 sps:$4 sm:$0xff]  }
  0xd0   : > { %2704 = vmatpush2.bf16.msra.mxu0 %v4215_v54  ;;  %v4271_v54 = vld [vmem:[%s4765_s8 + $0x404] ss:$8 sps:$4 sm:$0xff]  }
  0xd1   : > { %2805 = vmatpush2.bf16.msra.mxu1 %v4218_v55  ;;  %2705 = vmatprep.subr.bf16.mxu0 %v4223_v56  ;;  %v4274_v55 = vld [vmem:[%s4765_s8 + $0x504] ss:$8 sps:$4 sm:$0xff]   ;;  %v3634_v56 = vcombine.high %v337_v46, %v345_v47 }
  0xd2   : > { %2806 = vmatprep.subr.bf16.mxu1 %v4226_v57  ;;  %v3636_v57 = vcombine.high %v338_v50, %v346_v51 }
  0xd4   : > { %2706 = vmatpush2.bf16.msra.mxu0 %v4221_v58  ;;  %v4269_v58 = vld [vmem:[%s4765_s8 + $0x400] ss:$8 sps:$4 sm:$0xff]  }
  0xd5   : > { %2807 = vmatpush2.bf16.msra.mxu1 %v4224_v59  ;;  %2877 = vmatprep.subr.bf16.mxu0 %v4229_v60  ;;  %v4272_v59 = vld [vmem:[%s4765_s8 + $0x500] ss:$8 sps:$4 sm:$0xff]   ;;  %v4277_v60 = vld [vmem:[%s4765_s8 + $0x4f4] ss:$8 sps:$4 sm:$0xff]  }
  0xd6   : > { %2978 = vmatprep.subr.bf16.mxu1 %v4232_v61  ;;  %v4280_v61 = vld [vmem:[%s4765_s8 + $0x5f4] ss:$8 sps:$4 sm:$0xff]  }
  0xd7   : > { %2708 = vmatmul.mubr.bf16.vlgmr.msra.gmra.mxu0 %v3569_v1  ;;  %v3633_v1 = vcombine.low %v337_v46, %v345_v47  ;;  %v4323_v46 = vld [vmem:[%s4765_s8 + $0x484] ss:$8 sps:$4 sm:$0xff]  }
  0xd8   : > { %2809 = vmatmul.mubr.bf16.vlgmr.msra.gmra.mxu1 %v3571_v2  ;;  %2878 = vmatpush1.bf16.msra.mxu0 %v4227_v62  ;;  %v353_v62 = vld [vmem:[#allocation3 + $0x290] sm:$0xff]  ;;  %v3635_v2 = vcombine.low %v338_v50, %v346_v51  ;;  %v4326_v47 = vld [vmem:[%s4765_s8 + $0x584] ss:$8 sps:$4 sm:$0xff]  }
  0xd9   : > { %2979 = vmatpush1.bf16.msra.mxu1 %v4230_v63  ;;  %2879 = vmatprep.subr.bf16.mxu0 %v4235_v6  ;;  %v361_v63 = vld [vmem:[#allocation3 + $0x2d0] sm:$0xff]  ;;  %v4283_v6 = vld [vmem:[%s4765_s8 + $0x4e4] ss:$8 sps:$4 sm:$0xff]  }
  0xda   : > { %2980 = vmatprep.subr.bf16.mxu1 %v4238_v7  ;;  %2717 = vmatprep.mubr.bf16.mxu0 %v3586_v8  ;;  %v4286_v7 = vld [vmem:[%s4765_s8 + $0x5e4] ss:$8 sps:$4 sm:$0xff]   ;;  %v3650_v8 = vcombine.high %v353_v62, %v361_v63  ;;  %v4329_v50 = vld [vmem:[%s4765_s8 + $0x674] ss:$8 sps:$4 sm:$0xff]  }
  0xdb   : > { %2818 = vmatprep.mubr.bf16.mxu1 %v3588_v9  ;;  %v3652_v9 = vcombine.high %v354_v0, %v362_v3  ;;  %v4332_v51 = vld [vmem:[%s4765_s8 + $0x774] ss:$8 sps:$4 sm:$0xff]   ;;  %v4333_v0 = vld [vmem:[%s4765_s8 + $0x660] ss:$8 sps:$4 sm:$0xff]  }
  0xdc   : > { %2880 = vmatpush1.bf16.msra.mxu0 %v4233_v10  ;;  %v4281_v10 = vld [vmem:[%s4765_s8 + $0x4e0] ss:$8 sps:$4 sm:$0xff]   ;;  %v4344_v3 = vld [vmem:[%s4765_s8 + $0x754] ss:$8 sps:$4 sm:$0xff]  }
  0xdd   : > { %2981 = vmatpush1.bf16.msra.mxu1 %v4236_v11  ;;  %2881 = vmatprep.subr.bf16.mxu0 %v4241_v12  ;;  %v4284_v11 = vld [vmem:[%s4765_s8 + $0x5e0] ss:$8 sps:$4 sm:$0xff]   ;;  %v4289_v12 = vld [vmem:[%s4765_s8 + $0x4d4] ss:$8 sps:$4 sm:$0xff]  }
  0xde   : > { %2982 = vmatprep.subr.bf16.mxu1 %v4244_v13  ;;  %v4292_v13 = vld [vmem:[%s4765_s8 + $0x5d4] ss:$8 sps:$4 sm:$0xff]  }
  0xdf   : > { %2718 = vmatmul.mubr.bf16.gmra.mxu0 %v3585_v17  ;;  %v370_v17 = vld [vmem:[#allocation3 + $0x318] sm:$0xff] }
  0xe0   : > { %2819 = vmatmul.mubr.bf16.gmra.mxu1 %v3587_v18  ;;  %2882 = vmatpush1.bf16.msra.mxu0 %v4239_v15  ;;  %v3649_v15 = vcombine.low %v353_v62, %v361_v63  ;;  %v4287_v18 = vld [vmem:[%s4765_s8 + $0x4d0] ss:$8 sps:$4 sm:$0xff]   ;;  %v3667_v32 = vcombine.low %v370_v17, %v370_v17 }
  0xe1   : > { %2983 = vmatpush1.bf16.msra.mxu1 %v4242_v21  ;;  %2883 = vmatprep.subr.bf16.mxu0 %v4247_v22  ;;  %v4298_v21 = vld [vmem:[%s4765_s8 + $0x5c4] ss:$8 sps:$4 sm:$0xff]   ;;  %v3666_v22 = vcombine.high %v369_v14, %v369_v14 }
  0xe2   : > { %2984 = vmatprep.subr.bf16.mxu1 %v4250_v23  ;;  %2727 = vmatprep.mubr.bf16.mxu0 %v3602_v24  ;;  %v3668_v23 = vcombine.high %v370_v17, %v370_v17  ;;  %v4293_v24 = vld [vmem:[%s4765_s8 + $0x4c0] ss:$8 sps:$4 sm:$0xff]  }
  0xe3   : > { %2828 = vmatprep.mubr.bf16.mxu1 %v3604_v25  ;;  %v4296_v25 = vld [vmem:[%s4765_s8 + $0x5c0] ss:$8 sps:$4 sm:$0xff]  }
  0xe4   : > { %2884 = vmatpush1.bf16.msra.mxu0 %v4245_v26  ;;  %v4303_v26 = vld [vmem:[%s4765_s8 + $0x4b4] ss:$8 sps:$4 sm:$0xff]   ;;  %v4348_v17 = vld [vmem:[%s4765_s8 + $0x740] ss:$8 sps:$4 sm:$0xff]  }
  0xe5   : > { %2985 = vmatpush1.bf16.msra.mxu1 %v4248_v27  ;;  %2885 = vmatprep.subr.bf16.mxu0 %v4253_v28  ;;  %v4306_v27 = vld [vmem:[%s4765_s8 + $0x5b4] ss:$8 sps:$4 sm:$0xff]   ;;  %v4301_v28 = vld [vmem:[%s4765_s8 + $0x4b0] ss:$8 sps:$4 sm:$0xff]  }
  0xe6   : > { %2986 = vmatprep.subr.bf16.mxu1 %v4256_v29  ;;  %v4304_v29 = vld [vmem:[%s4765_s8 + $0x5b0] ss:$8 sps:$4 sm:$0xff]  }
  0xe7   : > { %2728 = vmatmul.mubr.bf16.gmra.mxu0 %v3601_v33  ;;  %v283_v33 = vld [vmem:[#allocation3 + $0x60] sm:$0xff] }
  0xe8   : > { %2829 = vmatmul.mubr.bf16.gmra.mxu1 %v3603_v34  ;;  %2886 = vmatpush1.bf16.msra.mxu0 %v4251_v30  ;;  %v275_v30 = vld [vmem:[#allocation3 + $0x20] sm:$0xff]  ;;  %v276_v34 = vld [vmem:[#allocation3 + $0x28] sm:$0xff] }
  0xe9   : > { %2987 = vmatpush1.bf16.msra.mxu1 %v4254_v37  ;;  %2887 = vmatprep.subr.bf16.mxu0 %v4259_v38  ;;  %v4314_v37 = vld [vmem:[%s4765_s8 + $0x5a4] ss:$8 sps:$4 sm:$0xff]   ;;  %v3574_v38 = vcombine.high %v275_v30, %v283_v33 }
  0xea   : > { %2988 = vmatprep.subr.bf16.mxu1 %v4262_v39  ;;  %2737 = vmatprep.mubr.bf16.mxu0 %v3618_v40  ;;  %v3576_v39 = vcombine.high %v276_v34, %v284_v35  ;;  %v4309_v40 = vld [vmem:[%s4765_s8 + $0x4a0] ss:$8 sps:$4 sm:$0xff]  }
  0xeb   : > { %2838 = vmatprep.mubr.bf16.mxu1 %v3620_v41  ;;  %v4312_v41 = vld [vmem:[%s4765_s8 + $0x5a0] ss:$8 sps:$4 sm:$0xff]  }
  0xec   : > { %2888 = vmatpush1.bf16.msra.mxu0 %v4257_v42  ;;  %v4317_v42 = vld [vmem:[%s4765_s8 + $0x494] ss:$8 sps:$4 sm:$0xff]  }
  0xed   : > { %2989 = vmatpush1.bf16.msra.mxu1 %v4260_v43  ;;  %2889 = vmatprep.subr.bf16.mxu0 %v4265_v44  ;;  %v4320_v43 = vld [vmem:[%s4765_s8 + $0x594] ss:$8 sps:$4 sm:$0xff]   ;;  %v4315_v44 = vld [vmem:[%s4765_s8 + $0x490] ss:$8 sps:$4 sm:$0xff]  }
  0xee   : > { %2990 = vmatprep.subr.bf16.mxu1 %v4268_v45  ;;  %v4318_v45 = vld [vmem:[%s4765_s8 + $0x590] ss:$8 sps:$4 sm:$0xff]  }
  0xef   : > { %2738 = vmatmul.mubr.bf16.gmra.mxu0 %v3617_v48  ;;  %v4321_v48 = vld [vmem:[%s4765_s8 + $0x480] ss:$8 sps:$4 sm:$0xff]  }
  0xf0   : > { %2839 = vmatmul.mubr.bf16.gmra.mxu1 %v3619_v49  ;;  %2890 = vmatpush1.bf16.msra.mxu0 %v4263_v52  ;;  %v4324_v49 = vld [vmem:[%s4765_s8 + $0x580] ss:$8 sps:$4 sm:$0xff]  }
  0xf1   : > { %2991 = vmatpush1.bf16.msra.mxu1 %v4266_v53  ;;  %2891 = vmatprep.subr.bf16.mxu0 %v4271_v54  ;;  %v291_v52 = vld [vmem:[#allocation3 + $0xa0] sm:$0xff]  ;;  %v292_v54 = vld [vmem:[#allocation3 + $0xa8] sm:$0xff] }
  0xf2   : > { %2992 = vmatprep.subr.bf16.mxu1 %v4274_v55  ;;  %2747 = vmatprep.mubr.bf16.mxu0 %v3634_v56  ;;  %v299_v53 = vld [vmem:[#allocation3 + $0xe0] sm:$0xff]  ;;  %v3573_v55 = vcombine.low %v275_v30, %v283_v33  ;;  %v3575_v56 = vcombine.low %v276_v34, %v284_v35  ;;  %v4365_v34 = vld [vmem:[%s4765_s8 + $0x614] ss:$8 sps:$4 sm:$0xff]  }
  0xf3   : > { %2848 = vmatprep.mubr.bf16.mxu1 %v3636_v57  ;;  %v300_v57 = vld [vmem:[#allocation3 + $0xe8] sm:$0xff]  ;;  %v3590_v62 = vcombine.high %v291_v52, %v299_v53  ;;  %v4368_v35 = vld [vmem:[%s4765_s8 + $0x714] ss:$8 sps:$4 sm:$0xff]  }
  0xf4   : > { %2892 = vmatpush1.bf16.msra.mxu0 %v4269_v58  ;;  %v4327_v58 = vld [vmem:[%s4765_s8 + $0x670] ss:$8 sps:$4 sm:$0xff]   ;;  %v3592_v63 = vcombine.high %v292_v54, %v300_v57  ;;  %v4360_v33 = vld [vmem:[%s4765_s8 + $0x720] ss:$8 sps:$4 sm:$0xff]  }
  0xf5   : > { %2993 = vmatpush1.bf16.msra.mxu1 %v4272_v59  ;;  %2893 = vmatprep.subr.bf16.mxu0 %v4277_v60  ;;  %v4330_v59 = vld [vmem:[%s4765_s8 + $0x770] ss:$8 sps:$4 sm:$0xff]   ;;  %v4335_v60 = vld [vmem:[%s4765_s8 + $0x664] ss:$8 sps:$4 sm:$0xff]  }
  0xf6   : > { %2994 = vmatprep.subr.bf16.mxu1 %v4280_v61  ;;  %v4338_v61 = vld [vmem:[%s4765_s8 + $0x764] ss:$8 sps:$4 sm:$0xff]  }
  0xf7   : > { %2748 = vmatmul.mubr.bf16.gmra.mxu0 %v3633_v1  ;;  %v4336_v1 = vld [vmem:[%s4765_s8 + $0x760] ss:$8 sps:$4 sm:$0xff]  }
  0xf8   : > { %2849 = vmatmul.mubr.bf16.gmra.mxu1 %v3635_v2  ;;  %2894 = vmatpush2.bf16.msra.mxu0 %v4275_v4  ;;  %v4341_v2 = vld [vmem:[%s4765_s8 + $0x654] ss:$8 sps:$4 sm:$0xff]   ;;  %v307_v4 = vld [vmem:[#allocation3 + $0x120] sm:$0xff] }
  0xf9   : > { %2995 = vmatpush2.bf16.msra.mxu1 %v4278_v5  ;;  %2895 = vmatprep.subr.bf16.mxu0 %v4283_v6  ;;  %v3589_v5 = vcombine.low %v291_v52, %v299_v53  ;;  %v3591_v6 = vcombine.low %v292_v54, %v300_v57  ;;  %v355_v52 = vld [vmem:[#allocation3 + $0x2a0] sm:$0xff]  ;;  %v364_v57 = vld [vmem:[#allocation3 + $0x2e8] sm:$0xff] }
  0xfa   : > { %2996 = vmatprep.subr.bf16.mxu1 %v4286_v7  ;;  %2757 = vmatprep.mubr.bf16.mxu0 %v3650_v8  ;;  %v315_v7 = vld [vmem:[#allocation3 + $0x160] sm:$0xff]  ;;  %v308_v8 = vld [vmem:[#allocation3 + $0x128] sm:$0xff] }
  0xfb   : > { %2858 = vmatprep.mubr.bf16.mxu1 %v3652_v9  ;;  %v316_v9 = vld [vmem:[#allocation3 + $0x168] sm:$0xff]  ;;  %v3606_v14 = vcombine.high %v307_v4, %v315_v7 }
  0xfc   : > { %2896 = vmatpush2.bf16.msra.mxu0 %v4281_v10  ;;  %v4339_v10 = vld [vmem:[%s4765_s8 + $0x650] ss:$8 sps:$4 sm:$0xff]  }
  0xfd   : > { %2997 = vmatpush2.bf16.msra.mxu1 %v4284_v11  ;;  %2897 = vmatprep.subr.bf16.mxu0 %v4289_v12  ;;  %v4342_v11 = vld [vmem:[%s4765_s8 + $0x750] ss:$8 sps:$4 sm:$0xff]   ;;  %v4347_v12 = vld [vmem:[%s4765_s8 + $0x644] ss:$8 sps:$4 sm:$0xff]  }
  0xfe   : > { %2998 = vmatprep.subr.bf16.mxu1 %v4292_v13  ;;  %v4350_v13 = vld [vmem:[%s4765_s8 + $0x744] ss:$8 sps:$4 sm:$0xff]  }
  0xff   : > { %2758 = vmatmul.mubr.bf16.gmra.mxu0 %v3649_v15  ;;  %v3608_v15 = vcombine.high %v308_v8, %v316_v9 }
 0x100   : > { %2859 = vmatmul.mubr.bf16.gmra.mxu1 %v3651_v16  ;;  %2898 = vmatpush2.bf16.msra.mxu0 %v4287_v18  ;;  %v4345_v16 = vld [vmem:[%s4765_s8 + $0x640] ss:$8 sps:$4 sm:$0xff]   ;;  %v4353_v18 = vld [vmem:[%s4765_s8 + $0x634] ss:$8 sps:$4 sm:$0xff]  }
 0x101   : > { %2999 = vmatpush2.bf16.msra.mxu1 %v4290_v19  ;;  %2899 = vmatprep.subr.bf16.mxu0 %v4295_v20  ;;  %v4356_v19 = vld [vmem:[%s4765_s8 + $0x734] ss:$8 sps:$4 sm:$0xff]   ;;  %v323_v20 = vld [vmem:[#allocation3 + $0x1a0] sm:$0xff] }
 0x102   : > { %3000 = vmatprep.subr.bf16.mxu1 %v4298_v21  ;;  %2767 = vmatprep.mubr.bf16.mxu0 %v3666_v22  ;;  %v3605_v21 = vcombine.low %v307_v4, %v315_v7  ;;  %v3607_v22 = vcombine.low %v308_v8, %v316_v9  ;;  %v372_v7 = vld [vmem:[#allocation3 + $0x328] sm:$0xff]  ;;  %v4387_v8 = vld [vmem:[%s4765_s8 + $0x6d0] ss:$8 sps:$4 sm:$0xff]  }
 0x103   : > { %2868 = vmatprep.mubr.bf16.mxu1 %v3668_v23  ;;  %v331_v23 = vld [vmem:[#allocation3 + $0x1e0] sm:$0xff]  ;;  %v4390_v9 = vld [vmem:[%s4765_s8 + $0x7d0] ss:$8 sps:$4 sm:$0xff]  }
 0x104   : > { %2900 = vmatpush2.bf16.msra.mxu0 %v4293_v24  ;;  %v324_v24 = vld [vmem:[#allocation3 + $0x1a8] sm:$0xff]  ;;  %v3622_v30 = vcombine.high %v323_v20, %v331_v23 }
 0x105   : > { %3001 = vmatpush2.bf16.msra.mxu1 %v4296_v25  ;;  %2901 = vmatprep.subr.bf16.mxu0 %v4303_v26  ;;  %v332_v25 = vld [vmem:[#allocation3 + $0x1e8] sm:$0xff]  ;;  %v4351_v26 = vld [vmem:[%s4765_s8 + $0x630] ss:$8 sps:$4 sm:$0xff]  }
 0x106   : > { %3002 = vmatprep.subr.bf16.mxu1 %v4306_v27  ;;  %v4354_v27 = vld [vmem:[%s4765_s8 + $0x730] ss:$8 sps:$4 sm:$0xff]  }
 0x107   : > { %2768 = vmatmul.mubr.bf16.gmra.mxu0 %v3665_v31  ;;  %v3624_v31 = vcombine.high %v324_v24, %v332_v25 }
 0x108   : > { %2869 = vmatmul.mubr.bf16.gmra.mxu1 %v3667_v32  ;;  %2902 = vmatpush2.bf16.msra.mxu0 %v4301_v28  ;;  %v4359_v28 = vld [vmem:[%s4765_s8 + $0x624] ss:$8 sps:$4 sm:$0xff]   ;;  %v4357_v32 = vld [vmem:[%s4765_s8 + $0x620] ss:$8 sps:$4 sm:$0xff]  }
 0x109   : > { %3003 = vmatpush2.bf16.msra.mxu1 %v4304_v29  ;;  %2903 = vmatprep.subr.bf16.mxu0 %v4311_v36  ;;  %v4362_v29 = vld [vmem:[%s4765_s8 + $0x724] ss:$8 sps:$4 sm:$0xff]  }
 0x10a   : > { %3004 = vmatprep.subr.bf16.mxu1 %v4314_v37  ;;  %2909 = vmatprep.mubr.bf16.mxu0 %v3574_v38  ;;  %v339_v36 = vld [vmem:[#allocation3 + $0x220] sm:$0xff]  ;;  %v3621_v37 = vcombine.low %v323_v20, %v331_v23  ;;  %v3623_v38 = vcombine.low %v324_v24, %v332_v25  ;;  %v3671_v20 = vcombine.low %v372_v7, %v372_v7  ;;  %v286_v23 = vld [vmem:[#allocation3 + $0x78] sm:$0xff] }
 0x10b   : > { %3010 = vmatprep.mubr.bf16.mxu1 %v3576_v39  ;;  %v347_v39 = vld [vmem:[#allocation3 + $0x260] sm:$0xff]  ;;  %v4401_v24 = vld [vmem:[%s4765_s8 + $0x6b0] ss:$8 sps:$4 sm:$0xff]  }
 0x10c   : > { %2904 = vmatpush2.bf16.msra.mxu0 %v4309_v40  ;;  %v340_v40 = vld [vmem:[#allocation3 + $0x228] sm:$0xff]  ;;  %v3637_v53 = vcombine.low %v339_v36, %v347_v39  ;;  %v4404_v25 = vld [vmem:[%s4765_s8 + $0x7b0] ss:$8 sps:$4 sm:$0xff]  }
 0x10d   : > { %3005 = vmatpush2.bf16.msra.mxu1 %v4312_v41  ;;  %2905 = vmatprep.subr.bf16.mxu0 %v4317_v42  ;;  %v348_v41 = vld [vmem:[#allocation3 + $0x268] sm:$0xff]  ;;  %v4363_v42 = vld [vmem:[%s4765_s8 + $0x610] ss:$8 sps:$4 sm:$0xff]  }
 0x10e   : > { %3006 = vmatprep.subr.bf16.mxu1 %v4320_v43  ;;  %v4366_v43 = vld [vmem:[%s4765_s8 + $0x710] ss:$8 sps:$4 sm:$0xff]   ;;  %v3639_v54 = vcombine.low %v340_v40, %v348_v41 }
 0x110   : > { %2906 = vmatpush2.bf16.msra.mxu0 %v4315_v44  ;;  %v4371_v44 = vld [vmem:[%s4765_s8 + $0x604] ss:$8 sps:$4 sm:$0xff]  }
 0x111   : > { %3007 = vmatpush2.bf16.msra.mxu1 %v4318_v45  ;;  %2907 = vmatprep.subr.bf16.mxu0 %v4323_v46  ;;  %v4374_v45 = vld [vmem:[%s4765_s8 + $0x704] ss:$8 sps:$4 sm:$0xff]   ;;  %v3638_v46 = vcombine.high %v339_v36, %v347_v39  ;;  %v4424_v39 = vld [vmem:[%s4765_s8 + $0x780] ss:$8 sps:$4 sm:$0xff]  }
 0x112   : > { %3008 = vmatprep.subr.bf16.mxu1 %v4326_v47  ;;  %v3640_v47 = vcombine.high %v340_v40, %v348_v41  ;;  %v4423_v36 = vld [vmem:[%s4765_s8 + $0x684] ss:$8 sps:$4 sm:$0xff]   ;;  %v293_v40 = vld [vmem:[#allocation3 + $0xb0] sm:$0xff] }
 0x113   : > { %v301_v41 = vld [vmem:[#allocation3 + $0xf0] sm:$0xff] }
 0x114   : > { %2908 = vmatpush2.bf16.msra.mxu0 %v4321_v48  ;;  %v4369_v48 = vld [vmem:[%s4765_s8 + $0x600] ss:$8 sps:$4 sm:$0xff]  }
 0x115   : > { %3009 = vmatpush2.bf16.msra.mxu1 %v4324_v49  ;;  %3079 = vmatprep.subr.bf16.mxu0 %v4329_v50  ;;  %v4372_v49 = vld [vmem:[%s4765_s8 + $0x700] ss:$8 sps:$4 sm:$0xff]   ;;  %v4377_v50 = vld [vmem:[%s4765_s8 + $0x6f4] ss:$8 sps:$4 sm:$0xff]  }
 0x116   : > { %3180 = vmatprep.subr.bf16.mxu1 %v4332_v51  ;;  %v4380_v51 = vld [vmem:[%s4765_s8 + $0x7f4] ss:$8 sps:$4 sm:$0xff]  }
 0x117   : > { %2910 = vmatmul.mubr.bf16.vlgmr.msra.gmra.mxu0 %v3573_v55  ;;  %v363_v55 = vld [vmem:[#allocation3 + $0x2e0] sm:$0xff] }
 0x118   : > { %3011 = vmatmul.mubr.bf16.vlgmr.msra.gmra.mxu1 %v3575_v56  ;;  %3080 = vmatpush1.bf16.msra.mxu0 %v4327_v58  ;;  %v356_v56 = vld [vmem:[#allocation3 + $0x2a8] sm:$0xff]  ;;  %v4375_v58 = vld [vmem:[%s4765_s8 + $0x6f0] ss:$8 sps:$4 sm:$0xff]   ;;  %v3653_v4 = vcombine.low %v355_v52, %v363_v55 }
 0x119   : > { %3181 = vmatpush1.bf16.msra.mxu1 %v4330_v59  ;;  %3081 = vmatprep.subr.bf16.mxu0 %v4335_v60  ;;  %v4378_v59 = vld [vmem:[%s4765_s8 + $0x7f0] ss:$8 sps:$4 sm:$0xff]   ;;  %v4383_v60 = vld [vmem:[%s4765_s8 + $0x6e4] ss:$8 sps:$4 sm:$0xff]  }
 0x11a   : > { %3182 = vmatprep.subr.bf16.mxu1 %v4338_v61  ;;  %2919 = vmatprep.mubr.bf16.mxu0 %v3590_v62  ;;  %v4386_v61 = vld [vmem:[%s4765_s8 + $0x7e4] ss:$8 sps:$4 sm:$0xff]   ;;  %v3654_v62 = vcombine.high %v355_v52, %v363_v55  ;;  %v310_v55 = vld [vmem:[#allocation3 + $0x138] sm:$0xff] }
 0x11b   : > { %3020 = vmatprep.mubr.bf16.mxu1 %v3592_v63  ;;  %v3656_v63 = vcombine.high %v356_v56, %v364_v57 }
 0x11c   : > { %3082 = vmatpush1.bf16.msra.mxu0 %v4333_v0  ;;  %v4381_v0 = vld [vmem:[%s4765_s8 + $0x6e0] ss:$8 sps:$4 sm:$0xff]  }
 0x11d   : > { %3183 = vmatpush1.bf16.msra.mxu1 %v4336_v1  ;;  %3083 = vmatprep.subr.bf16.mxu0 %v4341_v2  ;;  %v4384_v1 = vld [vmem:[%s4765_s8 + $0x7e0] ss:$8 sps:$4 sm:$0xff]   ;;  %v4389_v2 = vld [vmem:[%s4765_s8 + $0x6d4] ss:$8 sps:$4 sm:$0xff]  }
 0x11e   : > { %3184 = vmatprep.subr.bf16.mxu1 %v4344_v3  ;;  %v4392_v3 = vld [vmem:[%s4765_s8 + $0x7d4] ss:$8 sps:$4 sm:$0xff]  }
 0x11f   : > { %2920 = vmatmul.mubr.bf16.gmra.mxu0 %v3589_v5  ;;  %v3655_v5 = vcombine.low %v356_v56, %v364_v57  ;;  %v318_v56 = vld [vmem:[#allocation3 + $0x178] sm:$0xff] }
 0x120   : > { %3021 = vmatmul.mubr.bf16.gmra.mxu1 %v3591_v6  ;;  %3084 = vmatpush1.bf16.msra.mxu0 %v4339_v10  ;;  %v371_v6 = vld [vmem:[#allocation3 + $0x320] sm:$0xff] }
 0x121   : > { %3185 = vmatpush1.bf16.msra.mxu1 %v4342_v11  ;;  %3085 = vmatprep.subr.bf16.mxu0 %v4347_v12  ;;  %v4395_v10 = vld [vmem:[%s4765_s8 + $0x6c4] ss:$8 sps:$4 sm:$0xff]   ;;  %v3670_v12 = vcombine.high %v371_v6, %v371_v6 }
 0x122   : > { %3186 = vmatprep.subr.bf16.mxu1 %v4350_v13  ;;  %2929 = vmatprep.mubr.bf16.mxu0 %v3606_v14  ;;  %v4398_v11 = vld [vmem:[%s4765_s8 + $0x7c4] ss:$8 sps:$4 sm:$0xff]   ;;  %v3672_v13 = vcombine.high %v372_v7, %v372_v7  ;;  %v4393_v14 = vld [vmem:[%s4765_s8 + $0x6c0] ss:$8 sps:$4 sm:$0xff]   ;;  %v325_v7 = vld [vmem:[#allocation3 + $0x1b0] sm:$0xff] }
 0x123   : > { %3030 = vmatprep.mubr.bf16.mxu1 %v3608_v15  ;;  %v4396_v15 = vld [vmem:[%s4765_s8 + $0x7c0] ss:$8 sps:$4 sm:$0xff]  }
 0x124   : > { %3086 = vmatpush1.bf16.msra.mxu0 %v4345_v16  ;;  %v4403_v16 = vld [vmem:[%s4765_s8 + $0x6b4] ss:$8 sps:$4 sm:$0xff]  }
 0x125   : > { %3187 = vmatpush1.bf16.msra.mxu1 %v4348_v17  ;;  %3087 = vmatprep.subr.bf16.mxu0 %v4353_v18  ;;  %v4406_v17 = vld [vmem:[%s4765_s8 + $0x7b4] ss:$8 sps:$4 sm:$0xff]  }
 0x126   : > { %3188 = vmatprep.subr.bf16.mxu1 %v4356_v19  ;;  %v277_v18 = vld [vmem:[#allocation3 + $0x30] sm:$0xff]  ;;  %v3669_v19 = vcombine.low %v371_v6, %v371_v6 }
 0x127   : > { %2930 = vmatmul.mubr.bf16.gmra.mxu0 %v3605_v21  ;;  %v285_v21 = vld [vmem:[#allocation3 + $0x70] sm:$0xff] }
 0x128   : > { %3031 = vmatmul.mubr.bf16.gmra.mxu1 %v3607_v22  ;;  %3088 = vmatpush1.bf16.msra.mxu0 %v4351_v26  ;;  %v278_v22 = vld [vmem:[#allocation3 + $0x38] sm:$0xff]  ;;  %v4411_v26 = vld [vmem:[%s4765_s8 + $0x6a4] ss:$8 sps:$4 sm:$0xff]  }
 0x129   : > { %3189 = vmatpush1.bf16.msra.mxu1 %v4354_v27  ;;  %3089 = vmatprep.subr.bf16.mxu0 %v4359_v28  ;;  %v4414_v27 = vld [vmem:[%s4765_s8 + $0x7a4] ss:$8 sps:$4 sm:$0xff]   ;;  %v3578_v28 = vcombine.high %v277_v18, %v285_v21 }
 0x12a   : > { %3190 = vmatprep.subr.bf16.mxu1 %v4362_v29  ;;  %2939 = vmatprep.mubr.bf16.mxu0 %v3622_v30  ;;  %v3580_v29 = vcombine.high %v278_v22, %v286_v23  ;;  %v4409_v30 = vld [vmem:[%s4765_s8 + $0x6a0] ss:$8 sps:$4 sm:$0xff]  }
 0x12b   : > { %3040 = vmatprep.mubr.bf16.mxu1 %v3624_v31  ;;  %v4412_v31 = vld [vmem:[%s4765_s8 + $0x7a0] ss:$8 sps:$4 sm:$0xff]  }
 0x12c   : > { %3090 = vmatpush1.bf16.msra.mxu0 %v4357_v32  ;;  %v4417_v32 = vld [vmem:[%s4765_s8 + $0x694] ss:$8 sps:$4 sm:$0xff]  }
 0x12d   : > { %3191 = vmatpush1.bf16.msra.mxu1 %v4360_v33  ;;  %3091 = vmatprep.subr.bf16.mxu0 %v4365_v34  ;;  %v4420_v33 = vld [vmem:[%s4765_s8 + $0x794] ss:$8 sps:$4 sm:$0xff]   ;;  %v4415_v34 = vld [vmem:[%s4765_s8 + $0x690] ss:$8 sps:$4 sm:$0xff]  }
 0x12e   : > { %3192 = vmatprep.subr.bf16.mxu1 %v4368_v35  ;;  %v4418_v35 = vld [vmem:[%s4765_s8 + $0x790] ss:$8 sps:$4 sm:$0xff]  }
 0x12f   : > { %2940 = vmatmul.mubr.bf16.gmra.mxu0 %v3621_v37  ;;  %v4426_v37 = vld [vmem:[%s4765_s8 + $0x784] ss:$8 sps:$4 sm:$0xff]  }
 0x130   : > { %3041 = vmatmul.mubr.bf16.gmra.mxu1 %v3623_v38  ;;  %3092 = vmatpush1.bf16.msra.mxu0 %v4363_v42  ;;  %v4421_v38 = vld [vmem:[%s4765_s8 + $0x680] ss:$8 sps:$4 sm:$0xff]   ;;  %v294_v42 = vld [vmem:[#allocation3 + $0xb8] sm:$0xff] }
 0x131   : > { %3193 = vmatpush1.bf16.msra.mxu1 %v4366_v43  ;;  %3093 = vmatprep.subr.bf16.mxu0 %v4371_v44  ;;  %v302_v43 = vld [vmem:[#allocation3 + $0xf8] sm:$0xff]  ;;  %v3577_v44 = vcombine.low %v277_v18, %v285_v21 }
 0x132   : > { %3194 = vmatprep.subr.bf16.mxu1 %v4374_v45  ;;  %2949 = vmatprep.mubr.bf16.mxu0 %v3638_v46  ;;  %v3579_v45 = vcombine.low %v278_v22, %v286_v23  ;;  %v3594_v46 = vcombine.high %v293_v40, %v301_v41 }
 0x133   : > { %3050 = vmatprep.mubr.bf16.mxu1 %v3640_v47  ;;  %v3596_v47 = vcombine.high %v294_v42, %v302_v43 }
 0x134   : > { %3094 = vmatpush1.bf16.msra.mxu0 %v4369_v48 }
 0x135   : > { %3195 = vmatpush1.bf16.msra.mxu1 %v4372_v49  ;;  %3095 = vmatprep.subr.bf16.mxu0 %v4377_v50 }
 0x136   : > { %3196 = vmatprep.subr.bf16.mxu1 %v4380_v51  ;;  %v309_v51 = vld [vmem:[#allocation3 + $0x130] sm:$0xff] }
 0x137   : > { %2950 = vmatmul.mubr.bf16.gmra.mxu0 %v3637_v53 }
 0x138   : > { %3051 = vmatmul.mubr.bf16.gmra.mxu1 %v3639_v54  ;;  %3096 = vmatpush2.bf16.msra.mxu0 %v4375_v58  ;;  %v317_v54 = vld [vmem:[#allocation3 + $0x170] sm:$0xff] }
 0x139   : > { %3197 = vmatpush2.bf16.msra.mxu1 %v4378_v59  ;;  %3097 = vmatprep.subr.bf16.mxu0 %v4383_v60  ;;  %v3593_v60 = vcombine.low %v293_v40, %v301_v41 }
 0x13a   : > { %3198 = vmatprep.subr.bf16.mxu1 %v4386_v61  ;;  %2959 = vmatprep.mubr.bf16.mxu0 %v3654_v62  ;;  %v3595_v61 = vcombine.low %v294_v42, %v302_v43 }
 0x13b   : > { %3060 = vmatprep.mubr.bf16.mxu1 %v3656_v63  ;;  %v3610_v63 = vcombine.high %v309_v51, %v317_v54 }
 0x13c   : > { %3098 = vmatpush2.bf16.msra.mxu0 %v4381_v0  ;;  %v3612_v0 = vcombine.high %v310_v55, %v318_v56 }
 0x13d   : > { %3199 = vmatpush2.bf16.msra.mxu1 %v4384_v1  ;;  %3099 = vmatprep.subr.bf16.mxu0 %v4389_v2 }
 0x13e   : > { %3200 = vmatprep.subr.bf16.mxu1 %v4392_v3 }
 0x13f   : > { %2960 = vmatmul.mubr.bf16.gmra.mxu0 %v3653_v4 }
 0x140   : > { %3061 = vmatmul.mubr.bf16.gmra.mxu1 %v3655_v5  ;;  %3100 = vmatpush2.bf16.msra.mxu0 %v4387_v8 }
 0x141   : > { %3201 = vmatpush2.bf16.msra.mxu1 %v4390_v9  ;;  %3101 = vmatprep.subr.bf16.mxu0 %v4395_v10  ;;  %v333_v10 = vld [vmem:[#allocation3 + $0x1f0] sm:$0xff] }
 0x142   : > { %3202 = vmatprep.subr.bf16.mxu1 %v4398_v11  ;;  %2969 = vmatprep.mubr.bf16.mxu0 %v3670_v12  ;;  %v326_v11 = vld [vmem:[#allocation3 + $0x1b8] sm:$0xff] }
 0x143   : > { %3070 = vmatprep.mubr.bf16.mxu1 %v3672_v13  ;;  %v334_v12 = vld [vmem:[#allocation3 + $0x1f8] sm:$0xff] }
 0x144   : > { %3102 = vmatpush2.bf16.msra.mxu0 %v4393_v14 }
 0x145   : > { %3203 = vmatpush2.bf16.msra.mxu1 %v4396_v15  ;;  %3103 = vmatprep.subr.bf16.mxu0 %v4403_v16  ;;  %v3609_v16 = vcombine.low %v309_v51, %v317_v54  ;;  %v365_v51 = vld [vmem:[#allocation3 + $0x2f0] sm:$0xff] }
 0x146   : > { %3204 = vmatprep.subr.bf16.mxu1 %v4406_v17  ;;  %v3611_v17 = vcombine.low %v310_v55, %v318_v56 }
 0x147   : > { %2970 = vmatmul.mubr.bf16.gmra.mxu0 %v3669_v19  ;;  %v3626_v19 = vcombine.high %v325_v7, %v333_v10 }
 0x148   : > { %3071 = vmatmul.mubr.bf16.gmra.mxu1 %v3671_v20  ;;  %3104 = vmatpush2.bf16.msra.mxu0 %v4401_v24  ;;  %v3628_v20 = vcombine.high %v326_v11, %v334_v12 }
 0x149   : > { %3205 = vmatpush2.bf16.msra.mxu1 %v4404_v25  ;;  %3105 = vmatprep.subr.bf16.mxu0 %v4411_v26 }
 0x14a   : > { %3206 = vmatprep.subr.bf16.mxu1 %v4414_v27  ;;  %3111 = vmatprep.mubr.bf16.mxu0 %v3578_v28  ;;  %v341_v27 = vld [vmem:[#allocation3 + $0x230] sm:$0xff] }
 0x14b   : > { %3212 = vmatprep.mubr.bf16.mxu1 %v3580_v29 }
 0x14c   : > { %3106 = vmatpush2.bf16.msra.mxu0 %v4409_v30  ;;  %v349_v30 = vld [vmem:[#allocation3 + $0x270] sm:$0xff] }
 0x14d   : > { %3207 = vmatpush2.bf16.msra.mxu1 %v4412_v31  ;;  %3107 = vmatprep.subr.bf16.mxu0 %v4417_v32  ;;  %v342_v31 = vld [vmem:[#allocation3 + $0x238] sm:$0xff] }
 0x14e   : > { %3208 = vmatprep.subr.bf16.mxu1 %v4420_v33  ;;  %v350_v32 = vld [vmem:[#allocation3 + $0x278] sm:$0xff] }
 0x14f   : > { %v3644_v40 = vcombine.high %v342_v31, %v350_v32 }
 0x150   : > { %3108 = vmatpush2.bf16.msra.mxu0 %v4415_v34 }
 0x151   : > { %3209 = vmatpush2.bf16.msra.mxu1 %v4418_v35  ;;  %3109 = vmatprep.subr.bf16.mxu0 %v4423_v36  ;;  %v3625_v36 = vcombine.low %v325_v7, %v333_v10  ;;  %v373_v10 = vld [vmem:[#allocation3 + $0x330] sm:$0xff] }
 0x152   : > { %3210 = vmatprep.subr.bf16.mxu1 %v4426_v37  ;;  %v3627_v37 = vcombine.low %v326_v11, %v334_v12  ;;  %v374_v11 = vld [vmem:[#allocation3 + $0x338] sm:$0xff] }
 0x154   : > { %3110 = vmatpush2.bf16.msra.mxu0 %v4421_v38 }
 0x155   : > { %3211 = vmatpush2.bf16.msra.mxu1 %v4424_v39  ;;  %v3642_v39 = vcombine.high %v341_v27, %v349_v30 }
 0x157   : > { %v2507_v48 = vpop.f32.mrf.mxu0  ;;  %3112 = vmatmul.mubr.bf16.vlgmr.msra.gmra.mxu0 %v3577_v44 }
 0x158   : > { %v2608_v49 = vpop.f32.mrf.mxu1  ;;  %3213 = vmatmul.mubr.bf16.vlgmr.msra.gmra.mxu1 %v3579_v45  ;;  %3121 = vmatprep.mubr.bf16.mxu0 %v3594_v46 }
 0x159   : > { %v5031_v50 = vadd.f32 %v2608_v49, %v2507_v48  ;;  %3222 = vmatprep.mubr.bf16.mxu1 %v3596_v47  ;;  %v2509_v52 = vpop.f32.mrf.mxu0  ;;  %v357_v47 = vld [vmem:[#allocation3 + $0x2b0] sm:$0xff] }
 0x15a   : > { %v2610_v53 = vpop.f32.mrf.mxu1 }
 0x15b   : > { %v5033_v57 = vadd.f32 %v2610_v53, %v2509_v52  ;;  %v2511_v58 = vpop.f32.mrf.mxu0  ;;  %v358_v52 = vld [vmem:[#allocation3 + $0x2b8] sm:$0xff] }
 0x15c   : > { %v2612_v59 = vpop.f32.mrf.mxu1  ;;  %v366_v53 = vld [vmem:[#allocation3 + $0x2f8] sm:$0xff] }
 0x15d   : > { %v5035_v62 = vadd.f32 %v2612_v59, %v2511_v58  ;;  %v2513_v1 = vpop.f32.mrf.mxu0  ;;  %v3641_v58 = vcombine.low %v341_v27, %v349_v30  ;;  %v3643_v59 = vcombine.low %v342_v31, %v350_v32 }
 0x15e   : > { %v2614_v2 = vpop.f32.mrf.mxu1 }
 0x15f   : > { %v5037_v3 = vadd.f32 %v2614_v2, %v2513_v1  ;;  %3122 = vmatmul.mubr.bf16.gmra.mxu0 %v3593_v60  ;;  %v2517_v4 = vpop.f32.mrf.mxu0 }
 0x160   : > { %3223 = vmatmul.mubr.bf16.gmra.mxu1 %v3595_v61  ;;  %v2618_v5 = vpop.f32.mrf.mxu1  ;;  %3131 = vmatprep.mubr.bf16.mxu0 %v3610_v63  ;;  %v3658_v61 = vcombine.high %v357_v47, %v365_v51  ;;  %v3660_v63 = vcombine.high %v358_v52, %v366_v53 }
 0x161   : > { %v5039_v6 = vadd.f32 %v2618_v5, %v2517_v4  ;;  %3232 = vmatprep.mubr.bf16.mxu1 %v3612_v0  ;;  %v2519_v8 = vpop.f32.mrf.mxu0 }
 0x162   : > { %v2620_v9 = vpop.f32.mrf.mxu1 }
 0x163   : > { %v5041_v13 = vadd.f32 %v2620_v9, %v2519_v8  ;;  %v2521_v14 = vpop.f32.mrf.mxu0 }
 0x164   : > { %v2622_v15 = vpop.f32.mrf.mxu1 }
 0x165   : > { %v5043_v18 = vadd.f32 %v2622_v15, %v2521_v14  ;;  %v2523_v21 = vpop.f32.mrf.mxu0 }
 0x166   : > { %v2624_v22 = vpop.f32.mrf.mxu1 }
 0x167   : > { %v5045_v23 = vadd.f32 %v2624_v22, %v2523_v21  ;;  %3132 = vmatmul.mubr.bf16.gmra.mxu0 %v3609_v16  ;;  %v2527_v24 = vpop.f32.mrf.mxu0  ;;  %v3657_v16 = vcombine.low %v357_v47, %v365_v51  ;;  %v3676_v21 = vcombine.high %v374_v11, %v374_v11 }
 0x168   : > { %3233 = vmatmul.mubr.bf16.gmra.mxu1 %v3611_v17  ;;  %v2628_v25 = vpop.f32.mrf.mxu1  ;;  %3141 = vmatprep.mubr.bf16.mxu0 %v3626_v19  ;;  %v3659_v17 = vcombine.low %v358_v52, %v366_v53 }
 0x169   : > { %v5047_v26 = vadd.f32 %v2628_v25, %v2527_v24  ;;  %3242 = vmatprep.mubr.bf16.mxu1 %v3628_v20  ;;  %v2529_v28 = vpop.f32.mrf.mxu0  ;;  %v3674_v20 = vcombine.high %v373_v10, %v373_v10 }
 0x16a   : > { %v2630_v29 = vpop.f32.mrf.mxu1 }
 0x16b   : > { %v5049_v33 = vadd.f32 %v2630_v29, %v2529_v28  ;;  %v2531_v34 = vpop.f32.mrf.mxu0 }
 0x16c   : > { %v2632_v35 = vpop.f32.mrf.mxu1 }
 0x16d   : > { %v5051_v38 = vadd.f32 %v2632_v35, %v2531_v34  ;;  %v2533_v41 = vpop.f32.mrf.mxu0 }
 0x16e   : > { %v2634_v42 = vpop.f32.mrf.mxu1 }
 0x16f   : > { %v5053_v43 = vadd.f32 %v2634_v42, %v2533_v41  ;;  %3142 = vmatmul.mubr.bf16.gmra.mxu0 %v3625_v36  ;;  %v2537_v44 = vpop.f32.mrf.mxu0  ;;  %v3673_v36 = vcombine.low %v373_v10, %v373_v10 }
 0x170   : > { %3243 = vmatmul.mubr.bf16.gmra.mxu1 %v3627_v37  ;;  %v2638_v45 = vpop.f32.mrf.mxu1  ;;  %3151 = vmatprep.mubr.bf16.mxu0 %v3642_v39  ;;  %v3675_v37 = vcombine.low %v374_v11, %v374_v11 }
 0x171   : > { %v5055_v46 = vadd.f32 %v2638_v45, %v2537_v44  ;;  %3252 = vmatprep.mubr.bf16.mxu1 %v3644_v40  ;;  %v2539_v48 = vpop.f32.mrf.mxu0 }
 0x172   : > { %v2640_v49 = vpop.f32.mrf.mxu1 }
 0x173   : > { %v5057_v54 = vadd.f32 %v2640_v49, %v2539_v48  ;;  %v2541_v55 = vpop.f32.mrf.mxu0 }
 0x174   : > { %v2642_v56 = vpop.f32.mrf.mxu1 }
 0x175   : > { %v5059_v60 = vadd.f32 %v2642_v56, %v2541_v55  ;;  %v2543_v0 = vpop.f32.mrf.mxu0 }
 0x176   : > { %v2644_v1 = vpop.f32.mrf.mxu1 }
 0x177   : > { %v5061_v2 = vadd.f32 %v2644_v1, %v2543_v0  ;;  %3152 = vmatmul.mubr.bf16.gmra.mxu0 %v3641_v58  ;;  %v2547_v4 = vpop.f32.mrf.mxu0 }
 0x178   : > { %3253 = vmatmul.mubr.bf16.gmra.mxu1 %v3643_v59  ;;  %v2648_v5 = vpop.f32.mrf.mxu1  ;;  %3161 = vmatprep.mubr.bf16.mxu0 %v3658_v61 }
 0x179   : > { %v5063_v7 = vadd.f32 %v2648_v5, %v2547_v4  ;;  %3262 = vmatprep.mubr.bf16.mxu1 %v3660_v63  ;;  %v2549_v8 = vpop.f32.mrf.mxu0 }
 0x17a   : > { %v2650_v9 = vpop.f32.mrf.mxu1 }
 0x17b   : > { %v5065_v12 = vadd.f32 %v2650_v9, %v2549_v8  ;;  %v2551_v14 = vpop.f32.mrf.mxu0 }
 0x17c   : > { %v2652_v15 = vpop.f32.mrf.mxu1 }
 0x17d   : > { %v5067_v19 = vadd.f32 %v2652_v15, %v2551_v14  ;;  %v2553_v22 = vpop.f32.mrf.mxu0 }
 0x17e   : > { %v2654_v24 = vpop.f32.mrf.mxu1 }
 0x17f   : > { %v5069_v25 = vadd.f32 %v2654_v24, %v2553_v22  ;;  %3162 = vmatmul.mubr.bf16.gmra.mxu0 %v3657_v16  ;;  %v2557_v27 = vpop.f32.mrf.mxu0 }
 0x180   : > { %3263 = vmatmul.mubr.bf16.gmra.mxu1 %v3659_v17  ;;  %v2658_v28 = vpop.f32.mrf.mxu1  ;;  %3171 = vmatprep.mubr.bf16.mxu0 %v3674_v20 }
 0x181   : > { %v5071_v29 = vadd.f32 %v2658_v28, %v2557_v27  ;;  %3272 = vmatprep.mubr.bf16.mxu1 %v3676_v21  ;;  %v2559_v30 = vpop.f32.mrf.mxu0 }
 0x182   : > { %v2660_v31 = vpop.f32.mrf.mxu1 }
 0x183   : > { %v5073_v32 = vadd.f32 %v2660_v31, %v2559_v30  ;;  %v2561_v34 = vpop.f32.mrf.mxu0 }
 0x184   : > { %v2662_v35 = vpop.f32.mrf.mxu1 }
 0x185   : > { %v5075_v39 = vadd.f32 %v2662_v35, %v2561_v34  ;;  %v2563_v40 = vpop.f32.mrf.mxu0 }
 0x186   : > { %v2664_v41 = vpop.f32.mrf.mxu1 }
 0x187   : > { %v5077_v42 = vadd.f32 %v2664_v41, %v2563_v40  ;;  %3172 = vmatmul.mubr.bf16.gmra.mxu0 %v3673_v36  ;;  %v2567_v44 = vpop.f32.mrf.mxu0 }
 0x188   : > { %3273 = vmatmul.mubr.bf16.gmra.mxu1 %v3675_v37  ;;  %v2668_v45 = vpop.f32.mrf.mxu1 }
 0x189   : > { %v5079_v47 = vadd.f32 %v2668_v45, %v2567_v44  ;;  %v2569_v48 = vpop.f32.mrf.mxu0 }
 0x18a   : > { %v2670_v49 = vpop.f32.mrf.mxu1 }
 0x18b   : > { %v5081_v51 = vadd.f32 %v2670_v49, %v2569_v48  ;;  %v2571_v52 = vpop.f32.mrf.mxu0 }
 0x18c   : > { %v2672_v53 = vpop.f32.mrf.mxu1 }
 0x18d   : > { %v2572_v55 = vpop.f32.mrf.mxu0 }
 0x18e   : > { %v2673_v56 = vpop.f32.mrf.mxu1 }
 0x197   : > { %v2709_v58 = vpop.f32.mrf.mxu0 }
 0x198   : > { %v2810_v59 = vpop.f32.mrf.mxu1  ;;  %v2710_v61 = vadd.f32 %v2709_v58, %v5031_v50 }
 0x199   : > { %v2711_v63 = vpop.f32.mrf.mxu0 }
 0x19a   : > { %v2812_v0 = vpop.f32.mrf.mxu1  ;;  %v5084_v1 = vadd.f32 %v2810_v59, %v2710_v61  ;;  %v2712_v4 = vadd.f32 %v2711_v63, %v5033_v57 }
 0x19b   : > { %v2713_v5 = vpop.f32.mrf.mxu0 }
 0x19c   : > { %v2814_v8 = vpop.f32.mrf.mxu1  ;;  %v5087_v9 = vadd.f32 %v2812_v0, %v2712_v4  ;;  %v2714_v10 = vadd.f32 %v2713_v5, %v5035_v62 }
 0x19d   : > { %v2715_v11 = vpop.f32.mrf.mxu0 }
 0x19e   : > { %v2816_v14 = vpop.f32.mrf.mxu1  ;;  %v5090_v15 = vadd.f32 %v2814_v8, %v2714_v10  ;;  %v2716_v16 = vadd.f32 %v2715_v11, %v5037_v3 }
 0x19f   : > { %v2719_v17 = vpop.f32.mrf.mxu0 }
 0x1a0   : > { %v2820_v50 = vpop.f32.mrf.mxu1  ;;  %v5093_v20 = vadd.f32 %v2816_v14, %v2716_v16  ;;  %v2720_v21 = vadd.f32 %v2719_v17, %v5039_v6 }
 0x1a1   : > { %v2721_v22 = vpop.f32.mrf.mxu0 }
 0x1a2   : > { %v2822_v57 = vpop.f32.mrf.mxu1  ;;  %v2722_v24 = vadd.f32 %v2721_v22, %v5041_v13  ;;  %v5097_v27 = vadd.f32 %v2820_v50, %v2720_v21 }
 0x1a3   : > { %v2723_v28 = vpop.f32.mrf.mxu0 }
 0x1a4   : > { %v2824_v62 = vpop.f32.mrf.mxu1  ;;  %v2724_v30 = vadd.f32 %v2723_v28, %v5043_v18  ;;  %v5100_v31 = vadd.f32 %v2822_v57, %v2722_v24 }
 0x1a5   : > { %v2725_v34 = vpop.f32.mrf.mxu0 }
 0x1a6   : > { %v2826_v3 = vpop.f32.mrf.mxu1  ;;  %v2726_v35 = vadd.f32 %v2725_v34, %v5045_v23  ;;  %v5103_v36 = vadd.f32 %v2824_v62, %v2724_v30 }
 0x1a7   : > { %v2729_v37 = vpop.f32.mrf.mxu0 }
 0x1a8   : > { %v2830_v6 = vpop.f32.mrf.mxu1  ;;  %v2730_v40 = vadd.f32 %v2729_v37, %v5047_v26  ;;  %v5106_v41 = vadd.f32 %v2826_v3, %v2726_v35 }
 0x1a9   : > { %v2731_v13 = vpop.f32.mrf.mxu0 }
 0x1aa   : > { %v2832_v44 = vpop.f32.mrf.mxu1  ;;  %v2732_v45 = vadd.f32 %v2731_v13, %v5049_v33  ;;  %v5109_v48 = vadd.f32 %v2830_v6, %v2730_v40 }
 0x1ab   : > { %v2733_v18 = vpop.f32.mrf.mxu0 }
 0x1ac   : > { %v2834_v49 = vpop.f32.mrf.mxu1  ;;  %v2734_v52 = vadd.f32 %v2733_v18, %v5051_v38  ;;  %v5112_v53 = vadd.f32 %v2832_v44, %v2732_v45 }
 0x1ad   : > { %v2735_v23 = vpop.f32.mrf.mxu0 }
 0x1ae   : > { %v2836_v55 = vpop.f32.mrf.mxu1  ;;  %v2736_v56 = vadd.f32 %v2735_v23, %v5053_v43  ;;  %v5115_v58 = vadd.f32 %v2834_v49, %v2734_v52 }
 0x1af   : > { %v2739_v26 = vpop.f32.mrf.mxu0 }
 0x1b0   : > { %v2840_v59 = vpop.f32.mrf.mxu1  ;;  %v2740_v61 = vadd.f32 %v2739_v26, %v5055_v46  ;;  %v5118_v63 = vadd.f32 %v2836_v55, %v2736_v56 }
 0x1b1   : > { %v2741_v33 = vpop.f32.mrf.mxu0 }
 0x1b2   : > { %v2842_v0 = vpop.f32.mrf.mxu1  ;;  %v2742_v4 = vadd.f32 %v2741_v33, %v5057_v54  ;;  %v5121_v5 = vadd.f32 %v2840_v59, %v2740_v61 }
 0x1b3   : > { %v2743_v38 = vpop.f32.mrf.mxu0 }
 0x1b4   : > { %v2844_v8 = vpop.f32.mrf.mxu1  ;;  %v2744_v10 = vadd.f32 %v2743_v38, %v5059_v60  ;;  %v5124_v11 = vadd.f32 %v2842_v0, %v2742_v4 }
 0x1b5   : > { %v2745_v43 = vpop.f32.mrf.mxu0 }
 0x1b6   : > { %v2846_v14 = vpop.f32.mrf.mxu1  ;;  %v2746_v16 = vadd.f32 %v2745_v43, %v5061_v2  ;;  %v5127_v17 = vadd.f32 %v2844_v8, %v2744_v10 }
 0x1b7   : > { %v2749_v46 = vpop.f32.mrf.mxu0 }
 0x1b8   : > { %v2850_v50 = vpop.f32.mrf.mxu1  ;;  %v2750_v21 = vadd.f32 %v2749_v46, %v5063_v7  ;;  %v5130_v22 = vadd.f32 %v2846_v14, %v2746_v16 }
 0x1b9   : > { %v2751_v54 = vpop.f32.mrf.mxu0 }
 0x1ba   : > { %v2852_v57 = vpop.f32.mrf.mxu1  ;;  %v2752_v24 = vadd.f32 %v2751_v54, %v5065_v12  ;;  %v5133_v28 = vadd.f32 %v2850_v50, %v2750_v21 }
 0x1bb   : > { %v2753_v60 = vpop.f32.mrf.mxu0 }
 0x1bc   : > { %v2854_v62 = vpop.f32.mrf.mxu1  ;;  %v2754_v30 = vadd.f32 %v2753_v60, %v5067_v19  ;;  %v5136_v34 = vadd.f32 %v2852_v57, %v2752_v24 }
 0x1bd   : > { %v2755_v2 = vpop.f32.mrf.mxu0 }
 0x1be   : > { %v2856_v3 = vpop.f32.mrf.mxu1  ;;  %v2756_v35 = vadd.f32 %v2755_v2, %v5069_v25  ;;  %v5139_v37 = vadd.f32 %v2854_v62, %v2754_v30 }
 0x1bf   : > { %v2759_v7 = vpop.f32.mrf.mxu0 }
 0x1c0   : > { %5479 = vst [vmem:[#allocation14_spill] sm:$0xff] %v5139_v37  ;;  %v2860_v6 = vpop.f32.mrf.mxu1  ;;  %v2760_v40 = vadd.f32 %v2759_v7, %v5071_v29  ;;  %v5142_v13 = vadd.f32 %v2856_v3, %v2756_v35 }
 0x1c1   : > { %v2761_v12 = vpop.f32.mrf.mxu0 }
 0x1c2   : > { %5480 = vst [vmem:[#allocation15_spill] sm:$0xff] %v5142_v13  ;;  %v2862_v44 = vpop.f32.mrf.mxu1  ;;  %v2762_v45 = vadd.f32 %v2761_v12, %v5073_v32  ;;  %v5145_v18 = vadd.f32 %v2860_v6, %v2760_v40 }
 0x1c3   : > { %v2763_v19 = vpop.f32.mrf.mxu0 }
 0x1c4   : > { %5481 = vst [vmem:[#allocation16_spill] sm:$0xff] %v5145_v18  ;;  %v2864_v49 = vpop.f32.mrf.mxu1  ;;  %v2764_v52 = vadd.f32 %v2763_v19, %v5075_v39  ;;  %v5148_v23 = vadd.f32 %v2862_v44, %v2762_v45 }
 0x1c5   : > { %v2765_v25 = vpop.f32.mrf.mxu0 }
 0x1c6   : > { %5482 = vst [vmem:[#allocation17_spill] sm:$0xff] %v5148_v23  ;;  %v2866_v55 = vpop.f32.mrf.mxu1  ;;  %v2766_v56 = vadd.f32 %v2765_v25, %v5077_v42  ;;  %v5151_v26 = vadd.f32 %v2864_v49, %v2764_v52 }
 0x1c7   : > { %v2769_v29 = vpop.f32.mrf.mxu0 }
 0x1c8   : > { %5483 = vst [vmem:[#allocation18_spill] sm:$0xff] %v5151_v26  ;;  %v2870_v59 = vpop.f32.mrf.mxu1  ;;  %v2770_v61 = vadd.f32 %v2769_v29, %v5079_v47  ;;  %v5154_v33 = vadd.f32 %v2866_v55, %v2766_v56 }
 0x1c9   : > { %v2771_v32 = vpop.f32.mrf.mxu0 }
 0x1ca   : > { %5484 = vst [vmem:[#allocation19_spill] sm:$0xff] %v5154_v33  ;;  %v2872_v0 = vpop.f32.mrf.mxu1  ;;  %v2772_v4 = vadd.f32 %v2771_v32, %v5081_v51  ;;  %v5157_v38 = vadd.f32 %v2870_v59, %v2770_v61 }
 0x1cb   : > { %v2773_v39 = vpop.f32.mrf.mxu0 }
 0x1cc   : > { %5485 = vst [vmem:[#allocation20_spill] sm:$0xff] %v5157_v38  ;;  %v2874_v8 = vpop.f32.mrf.mxu1  ;;  %v5159_v10 = vadd.f32 %v2872_v0, %v2772_v4 }
 0x1cd   : > { %v2774_v43 = vpop.f32.mrf.mxu0 }
 0x1ce   : > { %5486 = vst [vmem:[#allocation21_spill] sm:$0xff] %v5159_v10  ;;  %v2875_v42 = vpop.f32.mrf.mxu1 }
 0x1d7   : > { %v2911_v14 = vpop.f32.mrf.mxu0 }
 0x1d8   : > { %v5161_v16 = vpop.f32.mrf.mxu1 }
 0x1d9   : > { %v2913_v46 = vpop.f32.mrf.mxu0 }
 0x1da   : > { %v5163_v50 = vpop.f32.mrf.mxu1 }
 0x1db   : > { %v5165_v47 = vpop.f32.mrf.mxu0 }
 0x1dc   : > { %v5167_v21 = vpop.f32.mrf.mxu1 }
 0x1dd   : > { %v2917_v54 = vpop.f32.mrf.mxu0 }
 0x1de   : > { %v5169_v51 = vpop.f32.mrf.mxu1 }
 0x1df   : > { %v5171_v57 = vpop.f32.mrf.mxu0 }
 0x1e0   : > { %v5173_v24 = vpop.f32.mrf.mxu1 }
 0x1e1   : > { %v5175_v60 = vpop.f32.mrf.mxu0 }
 0x1e2   : > { %v5177_v62 = vpop.f32.mrf.mxu1 }
 0x1e3   : > { %v5179_v30 = vpop.f32.mrf.mxu0 }
 0x1e4   : > { %v5181_v2 = vpop.f32.mrf.mxu1 }
 0x1e5   : > { %v5183_v3 = vpop.f32.mrf.mxu0 }
 0x1e6   : > { %v5185_v35 = vpop.f32.mrf.mxu1 }
 0x1e7   : > { %v5187_v7 = vpop.f32.mrf.mxu0 }
 0x1e8   : > { %v5189_v6 = vpop.f32.mrf.mxu1 }
 0x1e9   : > { %v5191_v40 = vpop.f32.mrf.mxu0 }
 0x1ea   : > { %v5193_v12 = vpop.f32.mrf.mxu1 }
 0x1eb   : > { %v5195_v44 = vpop.f32.mrf.mxu0 }
 0x1ec   : > { %v5197_v45 = vpop.f32.mrf.mxu1 }
 0x1ed   : > { %v5199_v19 = vpop.f32.mrf.mxu0 }
 0x1ee   : > { %v5201_v49 = vpop.f32.mrf.mxu1 }
 0x1ef   : > { %v5203_v52 = vpop.f32.mrf.mxu0 }
 0x1f0   : > { %v5205_v25 = vpop.f32.mrf.mxu1 }
 0x1f1   : > { %v5207_v55 = vpop.f32.mrf.mxu0 }
 0x1f2   : > { %v5209_v56 = vpop.f32.mrf.mxu1 }
 0x1f3   : > { %v5211_v29 = vpop.f32.mrf.mxu0 }
 0x1f4   : > { %v5213_v59 = vpop.f32.mrf.mxu1 }
 0x1f5   : > { %v5215_v61 = vpop.f32.mrf.mxu0 }
 0x1f6   : > { %v5217_v32 = vpop.f32.mrf.mxu1 }
 0x1f7   : > { %v5219_v0 = vpop.f32.mrf.mxu0 }
 0x1f8   : > { %v5221_v4 = vpop.f32.mrf.mxu1 }
 0x1f9   : > { %5487 = vst [vmem:[#allocation22_spill] sm:$0xff] %v5221_v4  ;;  %v5223_v39 = vpop.f32.mrf.mxu0 }
 0x1fa   : > { %5488 = vst [vmem:[#allocation23_spill] sm:$0xff] %v5223_v39  ;;  %v5225_v8 = vpop.f32.mrf.mxu1 }
 0x1fb   : > { %5489 = vst [vmem:[#allocation24_spill] sm:$0xff] %v5225_v8  ;;  %v5227_v43 = vpop.f32.mrf.mxu0 }
 0x1fc   : > { %5490 = vst [vmem:[#allocation25_spill] sm:$0xff] %v5227_v43  ;;  %v5229_v42 = vpop.f32.mrf.mxu1 }
 0x1fd   : > { %5491 = vst [vmem:[#allocation26_spill] sm:$0xff] %v5229_v42  ;;  %v5231_v10 = vpop.f32.mrf.mxu0 }
 0x1fe   : > { %5492 = vst [vmem:[#allocation27_spill] sm:$0xff] %v5231_v10  ;;  %v5233_v38 = vpop.f32.mrf.mxu1 }
 0x1ff   : > { %5493 = vst [vmem:[#allocation28_spill] sm:$0xff] %v5233_v38  ;;  %v5235_v33 = vpop.f32.mrf.mxu0 }
 0x200   : > { %5494 = vst [vmem:[#allocation29_spill] sm:$0xff] %v5235_v33  ;;  %v5237_v26 = vpop.f32.mrf.mxu1 }
 0x201   : > { %5495 = vst [vmem:[#allocation30_spill] sm:$0xff] %v5237_v26  ;;  %v5239_v23 = vpop.f32.mrf.mxu0 }
 0x202   : > { %5496 = vst [vmem:[#allocation31_spill] sm:$0xff] %v5239_v23  ;;  %v5241_v18 = vpop.f32.mrf.mxu1 }
 0x203   : > { %5497 = vst [vmem:[#allocation32_spill] sm:$0xff] %v5241_v18  ;;  %v5243_v13 = vpop.f32.mrf.mxu0  ;;  %v3368_v18 = vlaneseq }
 0x204   : > { %5498 = vst [vmem:[#allocation33_spill] sm:$0xff] %v5243_v13  ;;  %v5245_v8 = vpop.f32.mrf.mxu1 }
 0x205   : > { %5499 = vst [vmem:[#allocation34_spill] sm:$0xff] %v5245_v8  ;;  %v5247_v4 = vpop.f32.mrf.mxu0  ;;  %v3369_v8 = vshrl.u32 %v3368_v18, 7 }
 0x206   : > { %5500 = vst [vmem:[#allocation35_spill] sm:$0xff] %v5247_v4  ;;  %v5249_v42 = vpop.f32.mrf.mxu1 }
 0x207   : > { %5501 = vst [vmem:[#allocation36_spill] sm:$0xff] %v5249_v42  ;;  %v5251_v10 = vpop.f32.mrf.mxu0  ;;  %v2912_v42 = vadd.f32 %v2911_v14, %v5084_v1  ;;  %v3370_v4 = vsub.s32 0, %v3369_v8 }
 0x208   : > { %5502 = vst [vmem:[#allocation37_spill] sm:$0xff] %v5251_v10  ;;  %v5253_v38 = vpop.f32.mrf.mxu1  ;;  %v2914_v10 = vadd.f32 %v2913_v46, %v5087_v9 }
 0x209   : > { %5503 = vst [vmem:[#allocation38_spill] sm:$0xff] %v5253_v38  ;;  %v5255_v33 = vpop.f32.mrf.mxu0  ;;  %v3340_v38 = vld [vmem:[%s3339_s22] sm:$0x3] }
 0x20a   : > { %5504 = vst [vmem:[#allocation39_spill] sm:$0xff] %v5255_v33  ;;  %v5257_v26 = vpop.f32.mrf.mxu1  ;;  %v3374_v33 = vsub.s32 1, %v3369_v8  ;;  %v3015_v18 = vadd.f32 %v5163_v50, %v2914_v10  ;;  %v5270_v1 = vrot.slane %v3340_v38, %v3370_v4 }
 0x20b   : > { %5505 = vst [vmem:[#allocation40_spill] sm:$0xff] %v5257_v26  ;;  %v2975_v23 = vpop.f32.mrf.mxu0  ;;  %v3013_v26 = vadd.f32 %v5161_v16, %v2912_v42  ;;  %v2922_v16 = vadd.f32 %v5171_v57, %v5097_v27 }
 0x20c   : > { %v3076_v43 = vpop.f32.mrf.mxu1  ;;  %v2916_v23 = vadd.f32 %v5165_v47, %v5090_v15  ;;  %v5272_v46 = vrot.slane %v3340_v38, %v3374_v33  ;;  %v2926_v33 = vadd.f32 %v5179_v30, %v5103_v36 }
 0x20d   : > { %v2976_v13 = vpop.f32.mrf.mxu0  ;;  %v2918_v43 = vadd.f32 %v2917_v54, %v5093_v20  ;;  %v3023_v27 = vadd.f32 %v5173_v24, %v2922_v16 }
 0x20e   : > { %v3077_v37 = vpop.f32.mrf.mxu1  ;;  %v3017_v8 = vadd.f32 %v5167_v21, %v2916_v23 }
 0x20f   : > { %v3019_v20 = vadd.f32 %v5169_v51, %v2918_v43 }
 0x217   : > { %v3113_v13 = vpop.f32.mrf.mxu0 }
 0x218   : > { %v3214_v37 = vpop.f32.mrf.mxu1  ;;  %v3114_v39 = vadd.f32 %v3113_v13, %v3013_v26  ;;  %v2924_v26 = vadd.f32 %v5175_v60, %v5100_v31  ;;  %v2928_v60 = vadd.f32 %v5183_v3, %v5106_v41  ;;  %v3027_v13 = vadd.f32 %v5181_v2, %v2926_v33 }
 0x219   : > { %v3115_v9 = vpop.f32.mrf.mxu0 }
 0x21a   : > { %v3216_v14 = vpop.f32.mrf.mxu1  ;;  %v3215_v15 = vadd.f32 %v3214_v37, %v3114_v39  ;;  %v3116_v47 = vadd.f32 %v3115_v9, %v3015_v18  ;;  %v3025_v36 = vadd.f32 %v5177_v62, %v2924_v26  ;;  %v2932_v9 = vadd.f32 %v5187_v7, %v5109_v48 }
 0x21b   : > { %v3117_v54 = vpop.f32.mrf.mxu0  ;;  %v3029_v62 = vadd.f32 %v5185_v35, %v2928_v60  ;;  %v2936_v48 = vadd.f32 %v5195_v44, %v5115_v58  ;;  %v2944_v60 = vadd.f32 %v5207_v55, %v5124_v11  ;;  %v2948_v11 = vadd.f32 %v5215_v61, %v5130_v22 }
 0x21c   : > { %v3218_v42 = vpop.f32.mrf.mxu1  ;;  %v3378_v10 = vadd.f32 %v5270_v1, %v3215_v15  ;;  %v3217_v50 = vadd.f32 %v3216_v14, %v3116_v47  ;;  %v3118_v4 = vadd.f32 %v3117_v54, %v3017_v8  ;;  %v2934_v15 = vadd.f32 %v5191_v40, %v5112_v53 }
 0x21d   : > { %v3119_v38 = vpop.f32.mrf.mxu0  ;;  %v2938_v53 = vadd.f32 %v5199_v19, %v5118_v63 }
 0x21e   : > { %v3220_v21 = vpop.f32.mrf.mxu1  ;;  %3404 = vst [vmem:[%s5284_s29] sm:$0xff] %v3378_v10  ;;  %v3379_v51 = vadd.f32 %v5272_v46, %v3217_v50  ;;  %v3219_v31 = vadd.f32 %v3218_v42, %v3118_v4  ;;  %v3120_v57 = vadd.f32 %v3119_v38, %v3019_v20  ;;  %v3033_v42 = vadd.f32 %v5189_v6, %v2932_v9 }
 0x21f   : > { %v3123_v39 = vpop.f32.mrf.mxu0  ;;  %v3035_v4 = vadd.f32 %v5193_v12, %v2934_v15  ;;  %v3037_v6 = vadd.f32 %v5197_v45, %v2936_v48  ;;  %v3039_v12 = vadd.f32 %v5201_v49, %v2938_v53 }
 0x220   : > { %v3224_v23 = vpop.f32.mrf.mxu1  ;;  %3405 = vst [vmem:[%s5284_s29 + $0x8] sm:$0xff] %v3379_v51  ;;  %v3380_v24 = vadd.f32 %v5270_v1, %v3219_v31  ;;  %v3221_v30 = vadd.f32 %v3220_v21, %v3120_v57  ;;  %v3124_v43 = vadd.f32 %v3123_v39, %v3023_v27  ;;  %v2942_v27 = vadd.f32 %v5203_v52, %v5121_v5 }
 0x221   : > { %v3125_v37 = vpop.f32.mrf.mxu0  ;;  %v2946_v5 = vadd.f32 %v5211_v29, %v5127_v17 }
 0x222   : > { %v3226_v18 = vpop.f32.mrf.mxu1  ;;  %3406 = vst [vmem:[%s5284_s29 + $0x10] sm:$0xff] %v3380_v24  ;;  %v3381_v41 = vadd.f32 %v5272_v46, %v3221_v30  ;;  %v3225_v3 = vadd.f32 %v3224_v23, %v3124_v43  ;;  %v3126_v14 = vadd.f32 %v3125_v37, %v3025_v36  ;;  %v3043_v24 = vadd.f32 %v5205_v25, %v2942_v27 }
 0x223   : > { %v3127_v8 = vpop.f32.mrf.mxu0  ;;  %v3045_v37 = vadd.f32 %v5209_v56, %v2944_v60  ;;  %v3047_v25 = vadd.f32 %v5213_v59, %v2946_v5  ;;  %v3049_v56 = vadd.f32 %v5217_v32, %v2948_v11  ;;  %v5519_v11 = vld [vmem:[#allocation18_spill] sm:$0xff] }
 0x224   : > { %v3228_v16 = vpop.f32.mrf.mxu1  ;;  %3407 = vst [vmem:[%s5284_s29 + $0x18] sm:$0xff] %v3381_v41  ;;  %v3382_v2 = vadd.f32 %v5270_v1, %v3225_v3  ;;  %v3227_v47 = vadd.f32 %v3226_v18, %v3126_v14  ;;  %v3128_v20 = vadd.f32 %v3127_v8, %v3027_v13  ;;  %v2952_v3 = vadd.f32 %v5219_v0, %v5133_v28  ;;  %v5507_v28 = vld [vmem:[#allocation14_spill] sm:$0xff]  ;;  %v5508_v0 = vld [vmem:[#allocation25_spill] sm:$0xff] }
 0x225   : > { %v3129_v7 = vpop.f32.mrf.mxu0 }
 0x226   : > { %v3230_v54 = vpop.f32.mrf.mxu1  ;;  %3408 = vst [vmem:[%s5284_s29 + $0x20] sm:$0xff] %v3382_v2  ;;  %v3383_v35 = vadd.f32 %v5272_v46, %v3227_v47  ;;  %v3229_v26 = vadd.f32 %v3228_v16, %v3128_v20  ;;  %v3130_v10 = vadd.f32 %v3129_v7, %v3029_v62  ;;  %v5506_v16 = vld [vmem:[#allocation23_spill] sm:$0xff]  ;;  %v2956_v20 = vadd.f32 %v5508_v0, %v5507_v28 }
 0x227   : > { %v3133_v40 = vpop.f32.mrf.mxu0  ;;  %v2954_v15 = vadd.f32 %v5506_v16, %v5136_v34  ;;  %v5510_v34 = vld [vmem:[#allocation15_spill] sm:$0xff] }
 0x228   : > { %v3234_v50 = vpop.f32.mrf.mxu1  ;;  %3409 = vst [vmem:[%s5284_s29 + $0x28] sm:$0xff] %v3383_v35  ;;  %v3384_v58 = vadd.f32 %v5270_v1, %v3229_v26  ;;  %v3231_v44 = vadd.f32 %v3230_v54, %v3130_v10  ;;  %v3134_v33 = vadd.f32 %v3133_v40, %v3033_v42  ;;  %v5509_v54 = vld [vmem:[#allocation22_spill] sm:$0xff]  ;;  %v5511_v10 = vld [vmem:[#allocation27_spill] sm:$0xff] }
 0x229   : > { %v3135_v38 = vpop.f32.mrf.mxu0  ;;  %v3053_v42 = vadd.f32 %v5509_v54, %v2952_v3  ;;  %v2958_v53 = vadd.f32 %v5511_v10, %v5510_v34  ;;  %v5522_v3 = vld [vmem:[#allocation19_spill] sm:$0xff] }
 0x22a   : > { %v3236_v21 = vpop.f32.mrf.mxu1  ;;  %3410 = vst [vmem:[%s5284_s29 + $0x30] sm:$0xff] %v3384_v58  ;;  %v3385_v63 = vadd.f32 %v5272_v46, %v3231_v44  ;;  %v3235_v19 = vadd.f32 %v3234_v50, %v3134_v33  ;;  %v3136_v51 = vadd.f32 %v3135_v38, %v3035_v4  ;;  %v5512_v4 = vld [vmem:[#allocation24_spill] sm:$0xff]  ;;  %v5513_v38 = vld [vmem:[#allocation26_spill] sm:$0xff] }
 0x22b   : > { %v3137_v31 = vpop.f32.mrf.mxu0  ;;  %v3055_v58 = vadd.f32 %v5512_v4, %v2954_v15 }
 0x22c   : > { %v3238_v57 = vpop.f32.mrf.mxu1  ;;  %3411 = vst [vmem:[%s5284_s29 + $0x38] sm:$0xff] %v3385_v63  ;;  %v3386_v45 = vadd.f32 %v5270_v1, %v3235_v19  ;;  %v3237_v39 = vadd.f32 %v3236_v21, %v3136_v51  ;;  %v3138_v23 = vadd.f32 %v3137_v31, %v3037_v6  ;;  %v3057_v21 = vadd.f32 %v5513_v38, %v2956_v20  ;;  %v5514_v19 = vld [vmem:[#allocation16_spill] sm:$0xff]  ;;  %v5515_v51 = vld [vmem:[#allocation29_spill] sm:$0xff]  ;;  %v5531_v38 = vld [vmem:[#allocation38_spill] sm:$0xff] }
 0x22d   : > { %v3139_v52 = vpop.f32.mrf.mxu0  ;;  %v5526_v20 = vld [vmem:[#allocation20_spill] sm:$0xff] }
 0x22e   : > { %v3240_v36 = vpop.f32.mrf.mxu1  ;;  %3412 = vst [vmem:[%s5284_s29 + $0x40] sm:$0xff] %v3386_v45  ;;  %v3387_v49 = vadd.f32 %v5272_v46, %v3237_v39  ;;  %v3239_v30 = vadd.f32 %v3238_v57, %v3138_v23  ;;  %v3140_v43 = vadd.f32 %v3139_v52, %v3039_v12  ;;  %v2962_v12 = vadd.f32 %v5515_v51, %v5514_v19  ;;  %v5516_v45 = vld [vmem:[#allocation28_spill] sm:$0xff]  ;;  %v5517_v52 = vld [vmem:[#allocation17_spill] sm:$0xff] }
 0x22f   : > { %v3143_v55 = vpop.f32.mrf.mxu0  ;;  %v3059_v39 = vadd.f32 %v5516_v45, %v2958_v53  ;;  %v5529_v53 = vld [vmem:[#allocation21_spill] sm:$0xff] }
 0x230   : > { %v3244_v13 = vpop.f32.mrf.mxu1  ;;  %3413 = vst [vmem:[%s5284_s29 + $0x48] sm:$0xff] %v3387_v49  ;;  %v3388_v17 = vadd.f32 %v5270_v1, %v3239_v30  ;;  %v3241_v29 = vadd.f32 %v3240_v36, %v3140_v43  ;;  %v3144_v18 = vadd.f32 %v3143_v55, %v3043_v24  ;;  %v5518_v36 = vld [vmem:[#allocation31_spill] sm:$0xff]  ;;  %v5520_v55 = vld [vmem:[#allocation33_spill] sm:$0xff] }
 0x231   : > { %v3145_v9 = vpop.f32.mrf.mxu0  ;;  %v2964_v24 = vadd.f32 %v5518_v36, %v5517_v52 }
 0x232   : > { %v3246_v41 = vpop.f32.mrf.mxu1  ;;  %3414 = vst [vmem:[%s5284_s29 + $0x50] sm:$0xff] %v3388_v17  ;;  %v3389_v22 = vadd.f32 %v5272_v46, %v3241_v29  ;;  %v3245_v61 = vadd.f32 %v3244_v13, %v3144_v18  ;;  %v3146_v14 = vadd.f32 %v3145_v9, %v3045_v37  ;;  %v2966_v13 = vadd.f32 %v5520_v55, %v5519_v11  ;;  %v5521_v29 = vld [vmem:[#allocation30_spill] sm:$0xff] }
 0x233   : > { %v3147_v62 = vpop.f32.mrf.mxu0  ;;  %v3063_v18 = vadd.f32 %v5521_v29, %v2962_v12 }
 0x234   : > { %v3248_v8 = vpop.f32.mrf.mxu1  ;;  %3415 = vst [vmem:[%s5284_s29 + $0x58] sm:$0xff] %v3389_v22  ;;  %v3390_v59 = vadd.f32 %v5270_v1, %v3245_v61  ;;  %v3247_v2 = vadd.f32 %v3246_v41, %v3146_v14  ;;  %v3148_v47 = vadd.f32 %v3147_v62, %v3047_v25  ;;  %v5523_v22 = vld [vmem:[#allocation35_spill] sm:$0xff]  ;;  %v5524_v62 = vld [vmem:[#allocation32_spill] sm:$0xff] }
 0x235   : > { %v3149_v48 = vpop.f32.mrf.mxu0  ;;  %v2968_v61 = vadd.f32 %v5523_v22, %v5522_v3 }
 0x236   : > { %v3250_v7 = vpop.f32.mrf.mxu1  ;;  %3416 = vst [vmem:[%s5284_s29 + $0x60] sm:$0xff] %v3390_v59  ;;  %v3391_v32 = vadd.f32 %v5272_v46, %v3247_v2  ;;  %v3249_v35 = vadd.f32 %v3248_v8, %v3148_v47  ;;  %v3150_v26 = vadd.f32 %v3149_v48, %v3049_v56  ;;  %v3065_v8 = vadd.f32 %v5524_v62, %v2964_v24  ;;  %v5525_v2 = vld [vmem:[#allocation34_spill] sm:$0xff]  ;;  %v5527_v48 = vld [vmem:[#allocation37_spill] sm:$0xff] }
 0x237   : > { %v3153_v40 = vpop.f32.mrf.mxu0  ;;  %v3067_v47 = vadd.f32 %v5525_v2, %v2966_v13 }
 0x238   : > { %v3254_v50 = vpop.f32.mrf.mxu1  ;;  %3417 = vst [vmem:[%s5284_s29 + $0x68] sm:$0xff] %v3391_v32  ;;  %v3392_v44 = vadd.f32 %v5270_v1, %v3249_v35  ;;  %v3251_v33 = vadd.f32 %v3250_v7, %v3150_v26  ;;  %v3154_v6 = vadd.f32 %v3153_v40, %v3053_v42  ;;  %v2972_v7 = vadd.f32 %v5527_v48, %v5526_v20  ;;  %v5528_v35 = vld [vmem:[#allocation36_spill] sm:$0xff]  ;;  %v5530_v40 = vld [vmem:[#allocation39_spill] sm:$0xff] }
 0x239   : > { %v3155_v27 = vpop.f32.mrf.mxu0  ;;  %v3069_v26 = vadd.f32 %v5528_v35, %v2968_v61 }
 0x23a   : > { %v3256_v63 = vpop.f32.mrf.mxu1  ;;  %3418 = vst [vmem:[%s5284_s29 + $0x70] sm:$0xff] %v3392_v44  ;;  %v3393_v31 = vadd.f32 %v5272_v46, %v3251_v33  ;;  %v3255_v57 = vadd.f32 %v3254_v50, %v3154_v6  ;;  %v3156_v60 = vadd.f32 %v3155_v27, %v3055_v58  ;;  %v2974_v50 = vadd.f32 %v5530_v40, %v5529_v53 }
 0x23b   : > { %v3157_v23 = vpop.f32.mrf.mxu0 }
 0x23c   : > { %v3258_v5 = vpop.f32.mrf.mxu1  ;;  %3419 = vst [vmem:[%s5284_s29 + $0x78] sm:$0xff] %v3393_v31  ;;  %v3394_v49 = vadd.f32 %v5270_v1, %v3255_v57  ;;  %v3257_v30 = vadd.f32 %v3256_v63, %v3156_v60  ;;  %v3158_v43 = vadd.f32 %v3157_v23, %v3057_v21  ;;  %v3073_v21 = vadd.f32 %v5531_v38, %v2972_v7  ;;  %v5532_v31 = vld [vmem:[#allocation40_spill] sm:$0xff] }
 0x23d   : > { %v3159_v37 = vpop.f32.mrf.mxu0  ;;  %v3075_v57 = vadd.f32 %v5532_v31, %v2974_v50 }
 0x23e   : > { %v3260_v17 = vpop.f32.mrf.mxu1  ;;  %3420 = vst [vmem:[%s5284_s29 + $0x80] sm:$0xff] %v3394_v49  ;;  %v3395_v25 = vadd.f32 %v5272_v46, %v3257_v30  ;;  %v3259_v9 = vadd.f32 %v3258_v5, %v3158_v43  ;;  %v3160_v41 = vadd.f32 %v3159_v37, %v3059_v39 }
 0x23f   : > { %v3163_v14 = vpop.f32.mrf.mxu0 }
 0x240   : > { %v3264_v56 = vpop.f32.mrf.mxu1  ;;  %3421 = vst [vmem:[%s5284_s29 + $0x88] sm:$0xff] %v3395_v25  ;;  %v3396_v16 = vadd.f32 %v5270_v1, %v3259_v9  ;;  %v3261_v15 = vadd.f32 %v3260_v17, %v3160_v41  ;;  %v3164_v59 = vadd.f32 %v3163_v14, %v3063_v18 }
 0x241   : > { %v3165_v28 = vpop.f32.mrf.mxu0 }
 0x242   : > { %v3266_v0 = vpop.f32.mrf.mxu1  ;;  %3422 = vst [vmem:[%s5284_s29 + $0x90] sm:$0xff] %v3396_v16  ;;  %v3397_v54 = vadd.f32 %v5272_v46, %v3261_v15  ;;  %v3265_v42 = vadd.f32 %v3264_v56, %v3164_v59  ;;  %v3166_v32 = vadd.f32 %v3165_v28, %v3065_v8 }
 0x243   : > { %v3167_v34 = vpop.f32.mrf.mxu0 }
 0x244   : > { %v3268_v10 = vpop.f32.mrf.mxu1  ;;  %3423 = vst [vmem:[%s5284_s29 + $0x98] sm:$0xff] %v3397_v54  ;;  %v3398_v4 = vadd.f32 %v5270_v1, %v3265_v42  ;;  %v3267_v58 = vadd.f32 %v3266_v0, %v3166_v32  ;;  %v3168_v44 = vadd.f32 %v3167_v34, %v3067_v47 }
 0x245   : > { %v3169_v33 = vpop.f32.mrf.mxu0 }
 0x246   : > { %v3270_v6 = vpop.f32.mrf.mxu1  ;;  %3424 = vst [vmem:[%s5284_s29 + $0xa0] sm:$0xff] %v3398_v4  ;;  %v3399_v27 = vadd.f32 %v5272_v46, %v3267_v58  ;;  %v3269_v63 = vadd.f32 %v3268_v10, %v3168_v44  ;;  %v3170_v19 = vadd.f32 %v3169_v33, %v3069_v26 }
 0x247   : > { %v3173_v51 = vpop.f32.mrf.mxu0 }
 0x248   : > { %v3274_v12 = vpop.f32.mrf.mxu1  ;;  %3425 = vst [vmem:[%s5284_s29 + $0xa8] sm:$0xff] %v3399_v27  ;;  %v3400_v60 = vadd.f32 %v5270_v1, %v3269_v63  ;;  %v3271_v45 = vadd.f32 %v3270_v6, %v3170_v19  ;;  %v3174_v39 = vadd.f32 %v3173_v51, %v3073_v21 }
 0x249   : > { %v3175_v23 = vpop.f32.mrf.mxu0 }
 0x24a   : > { %v3276_v5 = vpop.f32.mrf.mxu1  ;;  %3426 = vst [vmem:[%s5284_s29 + $0xb0] sm:$0xff] %v3400_v60  ;;  %v3401_v52 = vadd.f32 %v5272_v46, %v3271_v45  ;;  %v3275_v36 = vadd.f32 %v3274_v12, %v3174_v39  ;;  %v3176_v24 = vadd.f32 %v3175_v23, %v3075_v57 }
 0x24b   : > { %v3177_v49 = vpop.f32.mrf.mxu0 }
 0x24c   : > { %v3278_v30 = vpop.f32.mrf.mxu1  ;;  %3427 = vst [vmem:[%s5284_s29 + $0xb8] sm:$0xff] %v3401_v52  ;;  %v3402_v43 = vadd.f32 %v5270_v1, %v3275_v36  ;;  %v3277_v11 = vadd.f32 %v3276_v5, %v3176_v24 }
 0x24d   : > { %v3178_v55 = vpop.f32.mrf.mxu0 }
 0x24e   : > { %v3279_v13 = vpop.f32.mrf.mxu1  ;;  %3428 = vst [vmem:[%s5284_s29 + $0xc0] sm:$0xff] %v3402_v43  ;;  %v3403_v37 = vadd.f32 %v5272_v46, %v3277_v11 }
 0x250   : > { %3429 = vst [vmem:[%s5284_s29 + $0xc8] sm:$0xff] %v3403_v37 }
 0x251   : > { %4524 = shalt.err (!%p4521_p13)
}
 0x252   : > { %s4525_s9 = scalar_lea.hbm %s5397_s27, 3328  ;;  %s4529_s8 = scalar_lea.hbm %s5454_s3, 26624 }
 0x253   : > { %p4526_p0 = scmp.ne.s32.totalorder %s5397_s27, %s4525_s9  ;;  %p4530_p3 = scmp.lt.s32.totalorder %s5397_s27, %s5454_s3 }
 0x254   : > { %p4531_p7 = scmp.lt.s32.totalorder %s4529_s8, %s4525_s9 }
 0x255   : > { %p4527_p6 = pnand %p4526_p0, %p5533_p12 }
 0x256   : > { %p4532_p8 = por %p4531_p7, %p4530_p3 }
 0x257   : > { %p4528_p5 = pneg %p4527_p6 }
 0x259   : > { %p4533_p9 = pnand %p4532_p8, %p4528_p5 }
 0x25b   : > { %4536 = shalt.err (!%p4533_p9)
}
 0x25c   : > { %s4609_s22 = smov 256   ;;  %s4610_s25 = smov 2048  }
 0x25d   : > { %s4611_s29 = smov 16  }
 0x25e   : > { %3951 = dma.vmem_to_hbm [thread:$0]  (%p5533_p12), %s5401_s4, 3328, %s5397_s27, %s3431_s15, %s4609_s22, %s4610_s25, %s4611_s29  }
 0x25f PF: > { %p3973_p1 = scmp.ge.s32.totalorder %s4599_s17, 2  ;;  %s3459_s11 = sand.u32 1, %s4579_s12  }
 0x260   : > { %p5534_p2 = scmp.ne.s32.totalorder %s5465_s24, 0  ;;  %s3460_s19 = scalar_lea.sflag [#allocation5], %s3459_s11 }
 0x262   : > { %p3965_p4 = pnand %p3973_p1, %p5534_p2 }
 0x264   : > { %p3966_p10 = pneg %p3965_p4 }
 0x266   : > { %4574 = dma.done.wait (%p3966_p10), %s3460_s19, 3328  }
 0x267   : > { %4576 = vsyncadd (%p3966_p10), %s3460_s19, 4294963968  ;;  %s20_s17 = sadd.s32 1, %s4599_s17   ;;  %s5535_s12 = smov %s4583_s13 }
 0x268   : > { %p17_p11 = scmp.ge.s32.totalorder %s20_s17, 10   ;;  %s5536_s13 = smov %s4587_s14 }
 0x269   : > { %s5537_s14 = smov %s4747_s10  ;;  %s5538_s15 = smov %s4595_s16 }
 0x26a   : > { %s5539_s16 = smov %s5541_s26  ;;  %19 = sbr.rel (!%p17_p11) target bundleno = 9 (0x9), region = 96 }
 0x26f   :  { %3465 = vsyncpa [#allocation4], 1 }
 0x270   :  { %3467 = vsyncpa [#allocation4 + $0x1], 1 }
 0x271   :  { %3468 = vsyncpa [#allocation7], 1 }
 0x272   :  { %3470 = vsyncpa [#allocation7 + $0x1], 1 }
 0x273   :  { %3471 = vsyncpa [#allocation5], 1 }
 0x274   :  { %3473 = vsyncpa [#allocation5 + $0x1], 1 }

</bundles_post_ra>
